<compile_context>
chip_gen: v7x
topology: tpu7x:2x2x1
jax: 0.10.0
libtpu: 0.0.40
codegen_flags: <defaults>
</compile_context>

<pallas_src>
import functools

import jax
import jax.numpy as jnp
from jax.experimental import pallas as pl
from jax.experimental.pallas import tpu as pltpu


# ----------------------------------------------------------------------------
# Pallas kernel: tiled matmul -> (optional) InstanceNorm -> (optional) LeakyReLU
# ----------------------------------------------------------------------------
def _conv_block_kernel(p_ref, w_ref, o_ref, acc_ref, *, norm, act):
    # p_ref: (1, TP, TK) bf16 patches; w_ref: (TK, Cout_pad) bf16;
    # o_ref: (1, TP, Cout_pad) f32; acc_ref: (TP, Cout_pad) f32 scratch.
    k = pl.program_id(2)

    @pl.when(k == 0)
    def _init():
        acc_ref[...] = jnp.zeros_like(acc_ref)

    # bf16 x bf16 -> f32 accumulate on the MXU.
    acc_ref[...] += jnp.dot(p_ref[0], w_ref[...],
                            preferred_element_type=jnp.float32)

    @pl.when(k == pl.num_programs(2) - 1)
    def _finalize():
        y = acc_ref[...]                                   # (TP, Cout_pad) f32
        if norm:
            # InstanceNorm2d(affine=False, eps=1e-5): per-sample, per-channel
            # statistics over spatial (full P is resident in this block).
            mean = jnp.mean(y, axis=0, keepdims=True)
            var = jnp.mean(jnp.square(y - mean), axis=0, keepdims=True)
            y = (y - mean) * jax.lax.rsqrt(var + 1e-5)
        if act:
            y = jnp.where(y > 0, y, 0.2 * y)               # LeakyReLU(0.2)
        o_ref[0] = y.astype(o_ref.dtype)                   # single lane-dense store


# ----------------------------------------------------------------------------
# JAX glue: channels-last im2col and per-layer wrapper around pallas_call
# ----------------------------------------------------------------------------
def _round_up(x, m):
    return (x + m - 1) // m * m


def _pick_tile(total, unit, cap):
    """Largest divisor of `total` that is a multiple of `unit` and <= cap."""
    if total % unit != 0:
        return None
    best = None
    t = unit
    lim = min(total, cap)
    while t <= lim:
        if total % t == 0:
            best = t
        t += unit
    return best


def _im2col_nhwc(x, k, stride, pad):
    """x: (N, H, W, C) -> patches (N, Ho*Wo, k*k*C) with (kh, kw, C) ordering."""
    N, H, W, C = x.shape
    xp = jnp.pad(x, ((0, 0), (pad, pad), (pad, pad), (0, 0)))
    Ho = (H + 2 * pad - k) // stride + 1
    Wo = (W + 2 * pad - k) // stride + 1
    slabs = []
    for i in range(k):
        for j in range(k):
            slabs.append(xp[:, i:i + (Ho - 1) * stride + 1:stride,
                               j:j + (Wo - 1) * stride + 1:stride, :])
    p = jnp.concatenate(slabs, axis=-1)                    # (N, Ho, Wo, k*k*C)
    return p.reshape(N, Ho * Wo, k * k * C), Ho, Wo
    # TODO(synk): fold the 4x4 window extraction into the kernel (16 shifted
    # (TP,C)@(C,Cout) matmuls) to remove the im2col HBM read amplification.


def conv_block(x, w, *, stride, pad, norm, act):
    """Conv2d(k=4, bias=False) [+ InstanceNorm2d] [+ LeakyReLU(0.2)], NHWC.

    x: (N, H, W, Cin) f32, w: (Cout, Cin, k, k) f32 -> (N, Ho, Wo, Cout) f32."""
    N, H, W, C = x.shape
    Cout, _, kk, _ = w.shape

    patches, Ho, Wo = _im2col_nhwc(x, kk, stride, pad)     # (N, P, K)
    P = Ho * Wo
    K = C * kk * kk

    # Pad the reduction dim to a lane multiple, and Cout to lane-dense 128s.
    K_pad = _round_up(K, 128)
    Cout_pad = _round_up(Cout, 128)

    # PyTorch weight (Cout, Cin, kh, kw) -> (kh, kw, Cin) feature order -> (K, Cout)
    wm = w.transpose(0, 2, 3, 1).reshape(Cout, K).T        # (K, Cout)
    wm = jnp.pad(wm, ((0, K_pad - K), (0, Cout_pad - Cout)))
    if K_pad != K:
        patches = jnp.pad(patches, ((0, 0), (0, 0), (0, K_pad - K)))

    # bf16 operands (halved DMA bytes, 2x MXU); accumulation stays f32.
    patches = patches.astype(jnp.bfloat16)
    wm = wm.astype(jnp.bfloat16)

    # Tile sizes (multiples of 8 / 128, capped at 512).
    tk = _pick_tile(K_pad, 128, 512)
    if norm:
        tp = P          # InstanceNorm needs the full spatial extent resident
    else:
        tp = _pick_tile(P, 8, 512) or P
    n_pt = P // tp
    n_kt = K_pad // tk

    kernel = functools.partial(_conv_block_kernel, norm=norm, act=act)
    out = pl.pallas_call(
        kernel,
        out_shape=jax.ShapeDtypeStruct((N, P, Cout_pad), jnp.float32),
        grid_spec=pltpu.PrefetchScalarGridSpec(
            num_scalar_prefetch=0,
            grid=(N, n_pt, n_kt),
            in_specs=[
                pl.BlockSpec((1, tp, tk), lambda n, p, k: (n, p, k)),
                pl.BlockSpec((tk, Cout_pad), lambda n, p, k: (k, 0)),
            ],
            out_specs=pl.BlockSpec((1, tp, Cout_pad), lambda n, p, k: (n, p, 0)),
            scratch_shapes=[pltpu.VMEM((tp, Cout_pad), jnp.float32)],
        ),
        compiler_params=pltpu.CompilerParams(
            dimension_semantics=("parallel", "parallel", "arbitrary"),
            vmem_limit_bytes=48 * 1024 * 1024,
        ),
    )(patches, wm)

    # Strip channel padding; stay channels-last for the next layer.
    return out[:, :, :Cout].reshape(N, Ho, Wo, Cout)


# ----------------------------------------------------------------------------
# Discriminator forward (NCHW in / NCHW out, like the PyTorch module)
# ----------------------------------------------------------------------------
def init_params(key, in_chs=3, out_chs=1):
    chans = [(in_chs, 64), (64, 128), (128, 256), (256, 512), (512, out_chs)]
    params = []
    for ci, co in chans:
        key, sub = jax.random.split(key)
        params.append(0.02 * jax.random.normal(sub, (co, ci, 4, 4), jnp.float32))
    return params


def discriminator_forward(params, x):
    w1, w2, w3, w4, wf = params
    h = x.transpose(0, 2, 3, 1)                  # one NCHW -> NHWC at the boundary
    h = conv_block(h, w1, stride=2, pad=1, norm=False, act=True)   # C_k norm=False
    h = conv_block(h, w2, stride=2, pad=1, norm=True,  act=True)
    h = conv_block(h, w3, stride=2, pad=1, norm=True,  act=True)
    h = conv_block(h, w4, stride=2, pad=1, norm=True,  act=True)
    h = conv_block(h, wf, stride=1, pad=1, norm=False, act=False)  # final conv
    return h.transpose(0, 3, 1, 2)               # back to NCHW


if __name__ == "__main__":
    key = jax.random.PRNGKey(0)
    kx, kp = jax.random.split(key)
    # Spatial 32 so the final 4x4 / stride-1 / pad-1 conv still yields >= 1 px.
    x = jax.random.normal(kx, (2, 3, 32, 32), jnp.float32)
    params = init_params(kp, in_chs=3, out_chs=1)

    out = jax.jit(discriminator_forward)(params, x)
    jax.block_until_ready(out)
    assert out.shape == (2, 1, 1, 1), out.shape
    print("KERNEL_OK")
</pallas_src>

<mosaic_0001>
module attributes {stable_mosaic.version = 11 : i64} {
  func.func @_conv_block_kernel(%arg0: i32, %arg1: i32, %arg2: i32, %arg3: memref<1x256x128xbf16, #tpu.memory_space<vmem>>, %arg4: memref<128x128xbf16, #tpu.memory_space<vmem>>, %arg5: memref<1x256x128xf32, #tpu.memory_space<vmem>>, %arg6: memref<256x128xf32, #tpu.memory_space<vmem>>) attributes {dimension_semantics = [#tpu.dimension_semantics<parallel>, #tpu.dimension_semantics<parallel>, #tpu.dimension_semantics<arbitrary>], iteration_bounds = array<i64: 2, 1, 1>, scalar_prefetch = 0 : i64, scratch_operands = 1 : i64, tpu.core_type = #tpu.core_type<tc>, window_params = [{transform_indices = @transform_0, window_bounds = array<i64: 1, 256, 128>}, {transform_indices = @transform_1, window_bounds = array<i64: 128, 128>}, {transform_indices = @transform_2, window_bounds = array<i64: 1, 256, 128>}]} {
    %c0_i32 = arith.constant 0 : i32
    %0 = arith.cmpi eq, %arg2, %c0_i32 : i32
    %1 = arith.extui %0 : i1 to i32
    %c0_i32_0 = arith.constant 0 : i32
    %2 = arith.cmpi ne, %1, %c0_i32_0 : i32
    scf.if %2 {
      %cst_11 = arith.constant 0.000000e+00 : f32
      %13 = vector.broadcast %cst_11 : f32 to vector<256x128xf32>
      %c0_12 = arith.constant 0 : index
      %c0_13 = arith.constant 0 : index
      %14 = vector.load %arg6[%c0_12, %c0_13] : memref<256x128xf32, #tpu.memory_space<vmem>>, vector<256x128xf32>
      tpu.vector_store %arg6[%c0_12, %c0_13], %13 {strides = array<i32>} : memref<256x128xf32, #tpu.memory_space<vmem>>, vector<256x128xf32>,
    } else {
    }
    %c0 = arith.constant 0 : index
    %c0_1 = arith.constant 0 : index
    %3 = vector.load %arg6[%c0, %c0_1] : memref<256x128xf32, #tpu.memory_space<vmem>>, vector<256x128xf32>
    %c0_2 = arith.constant 0 : index
    %c0_3 = arith.constant 0 : index
    %c0_4 = arith.constant 0 : index
    %4 = vector.load %arg3[%c0_2, %c0_3, %c0_4] : memref<1x256x128xbf16, #tpu.memory_space<vmem>>, vector<1x256x128xbf16>
    %5 = vector.shape_cast %4 : vector<1x256x128xbf16> to vector<256x128xbf16>
    %c0_5 = arith.constant 0 : index
    %c0_6 = arith.constant 0 : index
    %6 = vector.load %arg4[%c0_5, %c0_6] : memref<128x128xbf16, #tpu.memory_space<vmem>>, vector<128x128xbf16>
    %cst = arith.constant dense<0.000000e+00> : vector<256x128xf32>
    %7 = tpu.matmul %5, %6, %cst {dimension_numbers = #tpu.dot_dimension_numbers<[1], [0], [0], [1], [0, 0, 1, 1], [], []>} : vector<256x128xbf16>, vector<128x128xbf16>, vector<256x128xf32> -> vector<256x128xf32>
    %8 = arith.addf %3, %7 : vector<256x128xf32>
    %c0_7 = arith.constant 0 : index
    %c0_8 = arith.constant 0 : index
    %9 = vector.load %arg6[%c0_7, %c0_8] : memref<256x128xf32, #tpu.memory_space<vmem>>, vector<256x128xf32>
    tpu.vector_store %arg6[%c0_7, %c0_8], %8 {strides = array<i32>} : memref<256x128xf32, #tpu.memory_space<vmem>>, vector<256x128xf32>,
    %c0_i32_9 = arith.constant 0 : i32
    %10 = arith.cmpi eq, %arg2, %c0_i32_9 : i32
    %11 = arith.extui %10 : i1 to i32
    %c0_i32_10 = arith.constant 0 : i32
    %12 = arith.cmpi ne, %11, %c0_i32_10 : i32
    scf.if %12 {
      %c0_11 = arith.constant 0 : index
      %c0_12 = arith.constant 0 : index
      %13 = vector.load %arg6[%c0_11, %c0_12] : memref<256x128xf32, #tpu.memory_space<vmem>>, vector<256x128xf32>
      %cst_13 = arith.constant 0.000000e+00 : f32
      %14 = vector.broadcast %cst_13 : f32 to vector<256x128xf32>
      %15 = arith.cmpf ogt, %13, %14 : vector<256x128xf32>
      %cst_14 = arith.constant 2.000000e-01 : f32
      %16 = vector.broadcast %cst_14 : f32 to vector<256x128xf32>
      %17 = arith.mulf %16, %13 : vector<256x128xf32>
      %18 = arith.select %15, %13, %17 : vector<256x128xi1>, vector<256x128xf32>
      %c0_15 = arith.constant 0 : index
      %c0_16 = arith.constant 0 : index
      %c0_17 = arith.constant 0 : index
      %19 = vector.load %arg5[%c0_15, %c0_16, %c0_17] : memref<1x256x128xf32, #tpu.memory_space<vmem>>, vector<1x256x128xf32>
      %20 = vector.shape_cast %19 : vector<1x256x128xf32> to vector<256x128xf32>
      %21 = vector.shape_cast %18 : vector<256x128xf32> to vector<1x256x128xf32>
      tpu.vector_store %arg5[%c0_15, %c0_16, %c0_17], %21 {strides = array<i32>} : memref<1x256x128xf32, #tpu.memory_space<vmem>>, vector<1x256x128xf32>,
    } else {
    }
    return
  }
  func.func @transform_0(%arg0: i32, %arg1: i32, %arg2: i32) -> (i32, i32, i32) {
    %c0_i32 = arith.constant 0 : i32
    return %arg0, %arg1, %arg2 : i32, i32, i32
  }
  func.func @transform_1(%arg0: i32, %arg1: i32, %arg2: i32) -> (i32, i32) {
    %c0_i32 = arith.constant 0 : i32
    %c0_i32_0 = arith.constant 0 : i32
    return %arg2, %c0_i32 : i32, i32
  }
  func.func @transform_2(%arg0: i32, %arg1: i32, %arg2: i32) -> (i32, i32, i32) {
    %c0_i32 = arith.constant 0 : i32
    %c0_i32_0 = arith.constant 0 : i32
    return %arg0, %arg1, %c0_i32 : i32, i32, i32
  }
}

module attributes {stable_mosaic.version = 11 : i64} {
  func.func @_conv_block_kernel(%arg0: i32, %arg1: i32, %arg2: i32, %arg3: memref<1x64x512xbf16, #tpu.memory_space<vmem>>, %arg4: memref<512x128xbf16, #tpu.memory_space<vmem>>, %arg5: memref<1x64x128xf32, #tpu.memory_space<vmem>>, %arg6: memref<64x128xf32, #tpu.memory_space<vmem>>) attributes {dimension_semantics = [#tpu.dimension_semantics<parallel>, #tpu.dimension_semantics<parallel>, #tpu.dimension_semantics<arbitrary>], iteration_bounds = array<i64: 2, 1, 2>, scalar_prefetch = 0 : i64, scratch_operands = 1 : i64, tpu.core_type = #tpu.core_type<tc>, window_params = [{transform_indices = @transform_0, window_bounds = array<i64: 1, 64, 512>}, {transform_indices = @transform_1, window_bounds = array<i64: 512, 128>}, {transform_indices = @transform_2, window_bounds = array<i64: 1, 64, 128>}]} {
    %c0_i32 = arith.constant 0 : i32
    %0 = arith.cmpi eq, %arg2, %c0_i32 : i32
    %1 = arith.extui %0 : i1 to i32
    %c0_i32_0 = arith.constant 0 : i32
    %2 = arith.cmpi ne, %1, %c0_i32_0 : i32
    scf.if %2 {
      %cst_10 = arith.constant 0.000000e+00 : f32
      %13 = vector.broadcast %cst_10 : f32 to vector<64x128xf32>
      %c0_11 = arith.constant 0 : index
      %c0_12 = arith.constant 0 : index
      %14 = vector.load %arg6[%c0_11, %c0_12] : memref<64x128xf32, #tpu.memory_space<vmem>>, vector<64x128xf32>
      tpu.vector_store %arg6[%c0_11, %c0_12], %13 {strides = array<i32>} : memref<64x128xf32, #tpu.memory_space<vmem>>, vector<64x128xf32>,
    } else {
    }
    %c0 = arith.constant 0 : index
    %c0_1 = arith.constant 0 : index
    %3 = vector.load %arg6[%c0, %c0_1] : memref<64x128xf32, #tpu.memory_space<vmem>>, vector<64x128xf32>
    %c0_2 = arith.constant 0 : index
    %c0_3 = arith.constant 0 : index
    %c0_4 = arith.constant 0 : index
    %4 = vector.load %arg3[%c0_2, %c0_3, %c0_4] : memref<1x64x512xbf16, #tpu.memory_space<vmem>>, vector<1x64x512xbf16>
    %5 = vector.shape_cast %4 : vector<1x64x512xbf16> to vector<64x512xbf16>
    %c0_5 = arith.constant 0 : index
    %c0_6 = arith.constant 0 : index
    %6 = vector.load %arg4[%c0_5, %c0_6] : memref<512x128xbf16, #tpu.memory_space<vmem>>, vector<512x128xbf16>
    %cst = arith.constant dense<0.000000e+00> : vector<64x128xf32>
    %7 = tpu.matmul %5, %6, %cst {dimension_numbers = #tpu.dot_dimension_numbers<[1], [0], [0], [1], [0, 0, 1, 1], [], []>} : vector<64x512xbf16>, vector<512x128xbf16>, vector<64x128xf32> -> vector<64x128xf32>
    %8 = arith.addf %3, %7 : vector<64x128xf32>
    %c0_7 = arith.constant 0 : index
    %c0_8 = arith.constant 0 : index
    %9 = vector.load %arg6[%c0_7, %c0_8] : memref<64x128xf32, #tpu.memory_space<vmem>>, vector<64x128xf32>
    tpu.vector_store %arg6[%c0_7, %c0_8], %8 {strides = array<i32>} : memref<64x128xf32, #tpu.memory_space<vmem>>, vector<64x128xf32>,
    %c1_i32 = arith.constant 1 : i32
    %10 = arith.cmpi eq, %arg2, %c1_i32 : i32
    %11 = arith.extui %10 : i1 to i32
    %c0_i32_9 = arith.constant 0 : i32
    %12 = arith.cmpi ne, %11, %c0_i32_9 : i32
    scf.if %12 {
      %c0_10 = arith.constant 0 : index
      %c0_11 = arith.constant 0 : index
      %13 = vector.load %arg6[%c0_10, %c0_11] : memref<64x128xf32, #tpu.memory_space<vmem>>, vector<64x128xf32>
      %cst_12 = arith.constant dense<0.000000e+00> : vector<128xf32>
      %14 = vector.multi_reduction <add>, %13, %cst_12 [0] : vector<64x128xf32> to vector<128xf32>
      %15 = vector.shape_cast %14 : vector<128xf32> to vector<1x128xf32>
      %cst_13 = arith.constant 6.400000e+01 : f32
      %16 = vector.broadcast %cst_13 : f32 to vector<1x128xf32>
      %17 = arith.divf %15, %16 : vector<1x128xf32>
      %18 = vector.broadcast %17 : vector<1x128xf32> to vector<64x128xf32>
      %19 = arith.subf %13, %18 : vector<64x128xf32>
      %20 = arith.mulf %19, %19 : vector<64x128xf32>
      %cst_14 = arith.constant dense<0.000000e+00> : vector<128xf32>
      %21 = vector.multi_reduction <add>, %20, %cst_14 [0] : vector<64x128xf32> to vector<128xf32>
      %22 = vector.shape_cast %21 : vector<128xf32> to vector<1x128xf32>
      %cst_15 = arith.constant 6.400000e+01 : f32
      %23 = vector.broadcast %cst_15 : f32 to vector<1x128xf32>
      %24 = arith.divf %22, %23 : vector<1x128xf32>
      %25 = vector.broadcast %17 : vector<1x128xf32> to vector<64x128xf32>
      %26 = arith.subf %13, %25 : vector<64x128xf32>
      %cst_16 = arith.constant 9.99999974E-6 : f32
      %27 = vector.broadcast %cst_16 : f32 to vector<1x128xf32>
      %28 = arith.addf %24, %27 : vector<1x128xf32>
      %29 = math.rsqrt %28 : vector<1x128xf32>
      %30 = vector.broadcast %29 : vector<1x128xf32> to vector<64x128xf32>
      %31 = arith.mulf %26, %30 : vector<64x128xf32>
      %cst_17 = arith.constant 0.000000e+00 : f32
      %32 = vector.broadcast %cst_17 : f32 to vector<64x128xf32>
      %33 = arith.cmpf ogt, %31, %32 : vector<64x128xf32>
      %cst_18 = arith.constant 2.000000e-01 : f32
      %34 = vector.broadcast %cst_18 : f32 to vector<64x128xf32>
      %35 = arith.mulf %34, %31 : vector<64x128xf32>
      %36 = arith.select %33, %31, %35 : vector<64x128xi1>, vector<64x128xf32>
      %c0_19 = arith.constant 0 : index
      %c0_20 = arith.constant 0 : index
      %c0_21 = arith.constant 0 : index
      %37 = vector.load %arg5[%c0_19, %c0_20, %c0_21] : memref<1x64x128xf32, #tpu.memory_space<vmem>>, vector<1x64x128xf32>
      %38 = vector.shape_cast %37 : vector<1x64x128xf32> to vector<64x128xf32>
      %39 = vector.shape_cast %36 : vector<64x128xf32> to vector<1x64x128xf32>
      tpu.vector_store %arg5[%c0_19, %c0_20, %c0_21], %39 {strides = array<i32>} : memref<1x64x128xf32, #tpu.memory_space<vmem>>, vector<1x64x128xf32>,
    } else {
    }
    return
  }
  func.func @transform_0(%arg0: i32, %arg1: i32, %arg2: i32) -> (i32, i32, i32) {
    %c0_i32 = arith.constant 0 : i32
    return %arg0, %arg1, %arg2 : i32, i32, i32
  }
  func.func @transform_1(%arg0: i32, %arg1: i32, %arg2: i32) -> (i32, i32) {
    %c0_i32 = arith.constant 0 : i32
    %c0_i32_0 = arith.constant 0 : i32
    return %arg2, %c0_i32 : i32, i32
  }
  func.func @transform_2(%arg0: i32, %arg1: i32, %arg2: i32) -> (i32, i32, i32) {
    %c0_i32 = arith.constant 0 : i32
    %c0_i32_0 = arith.constant 0 : i32
    return %arg0, %arg1, %c0_i32 : i32, i32, i32
  }
}

module attributes {stable_mosaic.version = 11 : i64} {
  func.func @_conv_block_kernel(%arg0: i32, %arg1: i32, %arg2: i32, %arg3: memref<1x16x512xbf16, #tpu.memory_space<vmem>>, %arg4: memref<512x256xbf16, #tpu.memory_space<vmem>>, %arg5: memref<1x16x256xf32, #tpu.memory_space<vmem>>, %arg6: memref<16x256xf32, #tpu.memory_space<vmem>>) attributes {dimension_semantics = [#tpu.dimension_semantics<parallel>, #tpu.dimension_semantics<parallel>, #tpu.dimension_semantics<arbitrary>], iteration_bounds = array<i64: 2, 1, 4>, scalar_prefetch = 0 : i64, scratch_operands = 1 : i64, tpu.core_type = #tpu.core_type<tc>, window_params = [{transform_indices = @transform_0, window_bounds = array<i64: 1, 16, 512>}, {transform_indices = @transform_1, window_bounds = array<i64: 512, 256>}, {transform_indices = @transform_2, window_bounds = array<i64: 1, 16, 256>}]} {
    %c0_i32 = arith.constant 0 : i32
    %0 = arith.cmpi eq, %arg2, %c0_i32 : i32
    %1 = arith.extui %0 : i1 to i32
    %c0_i32_0 = arith.constant 0 : i32
    %2 = arith.cmpi ne, %1, %c0_i32_0 : i32
    scf.if %2 {
      %cst_10 = arith.constant 0.000000e+00 : f32
      %13 = vector.broadcast %cst_10 : f32 to vector<16x256xf32>
      %c0_11 = arith.constant 0 : index
      %c0_12 = arith.constant 0 : index
      %14 = vector.load %arg6[%c0_11, %c0_12] : memref<16x256xf32, #tpu.memory_space<vmem>>, vector<16x256xf32>
      tpu.vector_store %arg6[%c0_11, %c0_12], %13 {strides = array<i32>} : memref<16x256xf32, #tpu.memory_space<vmem>>, vector<16x256xf32>,
    } else {
    }
    %c0 = arith.constant 0 : index
    %c0_1 = arith.constant 0 : index
    %3 = vector.load %arg6[%c0, %c0_1] : memref<16x256xf32, #tpu.memory_space<vmem>>, vector<16x256xf32>
    %c0_2 = arith.constant 0 : index
    %c0_3 = arith.constant 0 : index
    %c0_4 = arith.constant 0 : index
    %4 = vector.load %arg3[%c0_2, %c0_3, %c0_4] : memref<1x16x512xbf16, #tpu.memory_space<vmem>>, vector<1x16x512xbf16>
    %5 = vector.shape_cast %4 : vector<1x16x512xbf16> to vector<16x512xbf16>
    %c0_5 = arith.constant 0 : index
    %c0_6 = arith.constant 0 : index
    %6 = vector.load %arg4[%c0_5, %c0_6] : memref<512x256xbf16, #tpu.memory_space<vmem>>, vector<512x256xbf16>
    %cst = arith.constant dense<0.000000e+00> : vector<16x256xf32>
    %7 = tpu.matmul %5, %6, %cst {dimension_numbers = #tpu.dot_dimension_numbers<[1], [0], [0], [1], [0, 0, 1, 1], [], []>} : vector<16x512xbf16>, vector<512x256xbf16>, vector<16x256xf32> -> vector<16x256xf32>
    %8 = arith.addf %3, %7 : vector<16x256xf32>
    %c0_7 = arith.constant 0 : index
    %c0_8 = arith.constant 0 : index
    %9 = vector.load %arg6[%c0_7, %c0_8] : memref<16x256xf32, #tpu.memory_space<vmem>>, vector<16x256xf32>
    tpu.vector_store %arg6[%c0_7, %c0_8], %8 {strides = array<i32>} : memref<16x256xf32, #tpu.memory_space<vmem>>, vector<16x256xf32>,
    %c3_i32 = arith.constant 3 : i32
    %10 = arith.cmpi eq, %arg2, %c3_i32 : i32
    %11 = arith.extui %10 : i1 to i32
    %c0_i32_9 = arith.constant 0 : i32
    %12 = arith.cmpi ne, %11, %c0_i32_9 : i32
    scf.if %12 {
      %c0_10 = arith.constant 0 : index
      %c0_11 = arith.constant 0 : index
      %13 = vector.load %arg6[%c0_10, %c0_11] : memref<16x256xf32, #tpu.memory_space<vmem>>, vector<16x256xf32>
      %cst_12 = arith.constant dense<0.000000e+00> : vector<256xf32>
      %14 = vector.multi_reduction <add>, %13, %cst_12 [0] : vector<16x256xf32> to vector<256xf32>
      %15 = vector.shape_cast %14 : vector<256xf32> to vector<1x256xf32>
      %cst_13 = arith.constant 1.600000e+01 : f32
      %16 = vector.broadcast %cst_13 : f32 to vector<1x256xf32>
      %17 = arith.divf %15, %16 : vector<1x256xf32>
      %18 = vector.broadcast %17 : vector<1x256xf32> to vector<16x256xf32>
      %19 = arith.subf %13, %18 : vector<16x256xf32>
      %20 = arith.mulf %19, %19 : vector<16x256xf32>
      %cst_14 = arith.constant dense<0.000000e+00> : vector<256xf32>
      %21 = vector.multi_reduction <add>, %20, %cst_14 [0] : vector<16x256xf32> to vector<256xf32>
      %22 = vector.shape_cast %21 : vector<256xf32> to vector<1x256xf32>
      %cst_15 = arith.constant 1.600000e+01 : f32
      %23 = vector.broadcast %cst_15 : f32 to vector<1x256xf32>
      %24 = arith.divf %22, %23 : vector<1x256xf32>
      %25 = vector.broadcast %17 : vector<1x256xf32> to vector<16x256xf32>
      %26 = arith.subf %13, %25 : vector<16x256xf32>
      %cst_16 = arith.constant 9.99999974E-6 : f32
      %27 = vector.broadcast %cst_16 : f32 to vector<1x256xf32>
      %28 = arith.addf %24, %27 : vector<1x256xf32>
      %29 = math.rsqrt %28 : vector<1x256xf32>
      %30 = vector.broadcast %29 : vector<1x256xf32> to vector<16x256xf32>
      %31 = arith.mulf %26, %30 : vector<16x256xf32>
      %cst_17 = arith.constant 0.000000e+00 : f32
      %32 = vector.broadcast %cst_17 : f32 to vector<16x256xf32>
      %33 = arith.cmpf ogt, %31, %32 : vector<16x256xf32>
      %cst_18 = arith.constant 2.000000e-01 : f32
      %34 = vector.broadcast %cst_18 : f32 to vector<16x256xf32>
      %35 = arith.mulf %34, %31 : vector<16x256xf32>
      %36 = arith.select %33, %31, %35 : vector<16x256xi1>, vector<16x256xf32>
      %c0_19 = arith.constant 0 : index
      %c0_20 = arith.constant 0 : index
      %c0_21 = arith.constant 0 : index
      %37 = vector.load %arg5[%c0_19, %c0_20, %c0_21] : memref<1x16x256xf32, #tpu.memory_space<vmem>>, vector<1x16x256xf32>
      %38 = vector.shape_cast %37 : vector<1x16x256xf32> to vector<16x256xf32>
      %39 = vector.shape_cast %36 : vector<16x256xf32> to vector<1x16x256xf32>
      tpu.vector_store %arg5[%c0_19, %c0_20, %c0_21], %39 {strides = array<i32>} : memref<1x16x256xf32, #tpu.memory_space<vmem>>, vector<1x16x256xf32>,
    } else {
    }
    return
  }
  func.func @transform_0(%arg0: i32, %arg1: i32, %arg2: i32) -> (i32, i32, i32) {
    %c0_i32 = arith.constant 0 : i32
    return %arg0, %arg1, %arg2 : i32, i32, i32
  }
  func.func @transform_1(%arg0: i32, %arg1: i32, %arg2: i32) -> (i32, i32) {
    %c0_i32 = arith.constant 0 : i32
    %c0_i32_0 = arith.constant 0 : i32
    return %arg2, %c0_i32 : i32, i32
  }
  func.func @transform_2(%arg0: i32, %arg1: i32, %arg2: i32) -> (i32, i32, i32) {
    %c0_i32 = arith.constant 0 : i32
    %c0_i32_0 = arith.constant 0 : i32
    return %arg0, %arg1, %c0_i32 : i32, i32, i32
  }
}

module attributes {stable_mosaic.version = 11 : i64} {
  func.func @_conv_block_kernel(%arg0: i32, %arg1: i32, %arg2: i32, %arg3: memref<1x4x512xbf16, #tpu.memory_space<vmem>>, %arg4: memref<512x512xbf16, #tpu.memory_space<vmem>>, %arg5: memref<1x4x512xf32, #tpu.memory_space<vmem>>, %arg6: memref<4x512xf32, #tpu.memory_space<vmem>>) attributes {dimension_semantics = [#tpu.dimension_semantics<parallel>, #tpu.dimension_semantics<parallel>, #tpu.dimension_semantics<arbitrary>], iteration_bounds = array<i64: 2, 1, 8>, scalar_prefetch = 0 : i64, scratch_operands = 1 : i64, tpu.core_type = #tpu.core_type<tc>, window_params = [{transform_indices = @transform_0, window_bounds = array<i64: 1, 4, 512>}, {transform_indices = @transform_1, window_bounds = array<i64: 512, 512>}, {transform_indices = @transform_2, window_bounds = array<i64: 1, 4, 512>}]} {
    %c0_i32 = arith.constant 0 : i32
    %0 = arith.cmpi eq, %arg2, %c0_i32 : i32
    %1 = arith.extui %0 : i1 to i32
    %c0_i32_0 = arith.constant 0 : i32
    %2 = arith.cmpi ne, %1, %c0_i32_0 : i32
    scf.if %2 {
      %cst_10 = arith.constant 0.000000e+00 : f32
      %13 = vector.broadcast %cst_10 : f32 to vector<4x512xf32>
      %c0_11 = arith.constant 0 : index
      %c0_12 = arith.constant 0 : index
      %14 = vector.load %arg6[%c0_11, %c0_12] : memref<4x512xf32, #tpu.memory_space<vmem>>, vector<4x512xf32>
      tpu.vector_store %arg6[%c0_11, %c0_12], %13 {strides = array<i32>} : memref<4x512xf32, #tpu.memory_space<vmem>>, vector<4x512xf32>,
    } else {
    }
    %c0 = arith.constant 0 : index
    %c0_1 = arith.constant 0 : index
    %3 = vector.load %arg6[%c0, %c0_1] : memref<4x512xf32, #tpu.memory_space<vmem>>, vector<4x512xf32>
    %c0_2 = arith.constant 0 : index
    %c0_3 = arith.constant 0 : index
    %c0_4 = arith.constant 0 : index
    %4 = vector.load %arg3[%c0_2, %c0_3, %c0_4] : memref<1x4x512xbf16, #tpu.memory_space<vmem>>, vector<1x4x512xbf16>
    %5 = vector.shape_cast %4 : vector<1x4x512xbf16> to vector<4x512xbf16>
    %c0_5 = arith.constant 0 : index
    %c0_6 = arith.constant 0 : index
    %6 = vector.load %arg4[%c0_5, %c0_6] : memref<512x512xbf16, #tpu.memory_space<vmem>>, vector<512x512xbf16>
    %cst = arith.constant dense<0.000000e+00> : vector<4x512xf32>
    %7 = tpu.matmul %5, %6, %cst {dimension_numbers = #tpu.dot_dimension_numbers<[1], [0], [0], [1], [0, 0, 1, 1], [], []>} : vector<4x512xbf16>, vector<512x512xbf16>, vector<4x512xf32> -> vector<4x512xf32>
    %8 = arith.addf %3, %7 : vector<4x512xf32>
    %c0_7 = arith.constant 0 : index
    %c0_8 = arith.constant 0 : index
    %9 = vector.load %arg6[%c0_7, %c0_8] : memref<4x512xf32, #tpu.memory_space<vmem>>, vector<4x512xf32>
    tpu.vector_store %arg6[%c0_7, %c0_8], %8 {strides = array<i32>} : memref<4x512xf32, #tpu.memory_space<vmem>>, vector<4x512xf32>,
    %c7_i32 = arith.constant 7 : i32
    %10 = arith.cmpi eq, %arg2, %c7_i32 : i32
    %11 = arith.extui %10 : i1 to i32
    %c0_i32_9 = arith.constant 0 : i32
    %12 = arith.cmpi ne, %11, %c0_i32_9 : i32
    scf.if %12 {
      %c0_10 = arith.constant 0 : index
      %c0_11 = arith.constant 0 : index
      %13 = vector.load %arg6[%c0_10, %c0_11] : memref<4x512xf32, #tpu.memory_space<vmem>>, vector<4x512xf32>
      %cst_12 = arith.constant dense<0.000000e+00> : vector<512xf32>
      %14 = vector.multi_reduction <add>, %13, %cst_12 [0] : vector<4x512xf32> to vector<512xf32>
      %15 = vector.shape_cast %14 : vector<512xf32> to vector<1x512xf32>
      %cst_13 = arith.constant 4.000000e+00 : f32
      %16 = vector.broadcast %cst_13 : f32 to vector<1x512xf32>
      %17 = arith.divf %15, %16 : vector<1x512xf32>
      %18 = vector.broadcast %17 : vector<1x512xf32> to vector<4x512xf32>
      %19 = arith.subf %13, %18 : vector<4x512xf32>
      %20 = arith.mulf %19, %19 : vector<4x512xf32>
      %cst_14 = arith.constant dense<0.000000e+00> : vector<512xf32>
      %21 = vector.multi_reduction <add>, %20, %cst_14 [0] : vector<4x512xf32> to vector<512xf32>
      %22 = vector.shape_cast %21 : vector<512xf32> to vector<1x512xf32>
      %cst_15 = arith.constant 4.000000e+00 : f32
      %23 = vector.broadcast %cst_15 : f32 to vector<1x512xf32>
      %24 = arith.divf %22, %23 : vector<1x512xf32>
      %25 = vector.broadcast %17 : vector<1x512xf32> to vector<4x512xf32>
      %26 = arith.subf %13, %25 : vector<4x512xf32>
      %cst_16 = arith.constant 9.99999974E-6 : f32
      %27 = vector.broadcast %cst_16 : f32 to vector<1x512xf32>
      %28 = arith.addf %24, %27 : vector<1x512xf32>
      %29 = math.rsqrt %28 : vector<1x512xf32>
      %30 = vector.broadcast %29 : vector<1x512xf32> to vector<4x512xf32>
      %31 = arith.mulf %26, %30 : vector<4x512xf32>
      %cst_17 = arith.constant 0.000000e+00 : f32
      %32 = vector.broadcast %cst_17 : f32 to vector<4x512xf32>
      %33 = arith.cmpf ogt, %31, %32 : vector<4x512xf32>
      %cst_18 = arith.constant 2.000000e-01 : f32
      %34 = vector.broadcast %cst_18 : f32 to vector<4x512xf32>
      %35 = arith.mulf %34, %31 : vector<4x512xf32>
      %36 = arith.select %33, %31, %35 : vector<4x512xi1>, vector<4x512xf32>
      %c0_19 = arith.constant 0 : index
      %c0_20 = arith.constant 0 : index
      %c0_21 = arith.constant 0 : index
      %37 = vector.load %arg5[%c0_19, %c0_20, %c0_21] : memref<1x4x512xf32, #tpu.memory_space<vmem>>, vector<1x4x512xf32>
      %38 = vector.shape_cast %37 : vector<1x4x512xf32> to vector<4x512xf32>
      %39 = vector.shape_cast %36 : vector<4x512xf32> to vector<1x4x512xf32>
      tpu.vector_store %arg5[%c0_19, %c0_20, %c0_21], %39 {strides = array<i32>} : memref<1x4x512xf32, #tpu.memory_space<vmem>>, vector<1x4x512xf32>,
    } else {
    }
    return
  }
  func.func @transform_0(%arg0: i32, %arg1: i32, %arg2: i32) -> (i32, i32, i32) {
    %c0_i32 = arith.constant 0 : i32
    return %arg0, %arg1, %arg2 : i32, i32, i32
  }
  func.func @transform_1(%arg0: i32, %arg1: i32, %arg2: i32) -> (i32, i32) {
    %c0_i32 = arith.constant 0 : i32
    %c0_i32_0 = arith.constant 0 : i32
    return %arg2, %c0_i32 : i32, i32
  }
  func.func @transform_2(%arg0: i32, %arg1: i32, %arg2: i32) -> (i32, i32, i32) {
    %c0_i32 = arith.constant 0 : i32
    %c0_i32_0 = arith.constant 0 : i32
    return %arg0, %arg1, %c0_i32 : i32, i32, i32
  }
}

module attributes {stable_mosaic.version = 11 : i64} {
  func.func @_conv_block_kernel(%arg0: i32, %arg1: i32, %arg2: i32, %arg3: memref<1x1x512xbf16, #tpu.memory_space<vmem>>, %arg4: memref<512x128xbf16, #tpu.memory_space<vmem>>, %arg5: memref<1x1x128xf32, #tpu.memory_space<vmem>>, %arg6: memref<1x128xf32, #tpu.memory_space<vmem>>) attributes {dimension_semantics = [#tpu.dimension_semantics<parallel>, #tpu.dimension_semantics<parallel>, #tpu.dimension_semantics<arbitrary>], iteration_bounds = array<i64: 2, 1, 16>, scalar_prefetch = 0 : i64, scratch_operands = 1 : i64, tpu.core_type = #tpu.core_type<tc>, window_params = [{transform_indices = @transform_0, window_bounds = array<i64: 1, 1, 512>}, {transform_indices = @transform_1, window_bounds = array<i64: 512, 128>}, {transform_indices = @transform_2, window_bounds = array<i64: 1, 1, 128>}]} {
    %c0_i32 = arith.constant 0 : i32
    %0 = arith.cmpi eq, %arg2, %c0_i32 : i32
    %1 = arith.extui %0 : i1 to i32
    %c0_i32_0 = arith.constant 0 : i32
    %2 = arith.cmpi ne, %1, %c0_i32_0 : i32
    scf.if %2 {
      %cst_10 = arith.constant 0.000000e+00 : f32
      %13 = vector.broadcast %cst_10 : f32 to vector<1x128xf32>
      %c0_11 = arith.constant 0 : index
      %c0_12 = arith.constant 0 : index
      %14 = vector.load %arg6[%c0_11, %c0_12] : memref<1x128xf32, #tpu.memory_space<vmem>>, vector<1x128xf32>
      tpu.vector_store %arg6[%c0_11, %c0_12], %13 {strides = array<i32>} : memref<1x128xf32, #tpu.memory_space<vmem>>, vector<1x128xf32>,
    } else {
    }
    %c0 = arith.constant 0 : index
    %c0_1 = arith.constant 0 : index
    %3 = vector.load %arg6[%c0, %c0_1] : memref<1x128xf32, #tpu.memory_space<vmem>>, vector<1x128xf32>
    %c0_2 = arith.constant 0 : index
    %c0_3 = arith.constant 0 : index
    %c0_4 = arith.constant 0 : index
    %4 = vector.load %arg3[%c0_2, %c0_3, %c0_4] : memref<1x1x512xbf16, #tpu.memory_space<vmem>>, vector<1x1x512xbf16>
    %5 = vector.shape_cast %4 : vector<1x1x512xbf16> to vector<1x512xbf16>
    %c0_5 = arith.constant 0 : index
    %c0_6 = arith.constant 0 : index
    %6 = vector.load %arg4[%c0_5, %c0_6] : memref<512x128xbf16, #tpu.memory_space<vmem>>, vector<512x128xbf16>
    %cst = arith.constant dense<0.000000e+00> : vector<1x128xf32>
    %7 = tpu.matmul %5, %6, %cst {dimension_numbers = #tpu.dot_dimension_numbers<[1], [0], [0], [1], [0, 0, 1, 1], [], []>} : vector<1x512xbf16>, vector<512x128xbf16>, vector<1x128xf32> -> vector<1x128xf32>
    %8 = arith.addf %3, %7 : vector<1x128xf32>
    %c0_7 = arith.constant 0 : index
    %c0_8 = arith.constant 0 : index
    %9 = vector.load %arg6[%c0_7, %c0_8] : memref<1x128xf32, #tpu.memory_space<vmem>>, vector<1x128xf32>
    tpu.vector_store %arg6[%c0_7, %c0_8], %8 {strides = array<i32>} : memref<1x128xf32, #tpu.memory_space<vmem>>, vector<1x128xf32>,
    %c15_i32 = arith.constant 15 : i32
    %10 = arith.cmpi eq, %arg2, %c15_i32 : i32
    %11 = arith.extui %10 : i1 to i32
    %c0_i32_9 = arith.constant 0 : i32
    %12 = arith.cmpi ne, %11, %c0_i32_9 : i32
    scf.if %12 {
      %c0_10 = arith.constant 0 : index
      %c0_11 = arith.constant 0 : index
      %13 = vector.load %arg6[%c0_10, %c0_11] : memref<1x128xf32, #tpu.memory_space<vmem>>, vector<1x128xf32>
      %c0_12 = arith.constant 0 : index
      %c0_13 = arith.constant 0 : index
      %c0_14 = arith.constant 0 : index
      %14 = vector.load %arg5[%c0_12, %c0_13, %c0_14] : memref<1x1x128xf32, #tpu.memory_space<vmem>>, vector<1x1x128xf32>
      %15 = vector.shape_cast %14 : vector<1x1x128xf32> to vector<1x128xf32>
      %16 = vector.shape_cast %13 : vector<1x128xf32> to vector<1x1x128xf32>
      tpu.vector_store %arg5[%c0_12, %c0_13, %c0_14], %16 {strides = array<i32>} : memref<1x1x128xf32, #tpu.memory_space<vmem>>, vector<1x1x128xf32>,
    } else {
    }
    return
  }
  func.func @transform_0(%arg0: i32, %arg1: i32, %arg2: i32) -> (i32, i32, i32) {
    %c0_i32 = arith.constant 0 : i32
    return %arg0, %arg1, %arg2 : i32, i32, i32
  }
  func.func @transform_1(%arg0: i32, %arg1: i32, %arg2: i32) -> (i32, i32) {
    %c0_i32 = arith.constant 0 : i32
    %c0_i32_0 = arith.constant 0 : i32
    return %arg2, %c0_i32 : i32, i32
  }
  func.func @transform_2(%arg0: i32, %arg1: i32, %arg2: i32) -> (i32, i32, i32) {
    %c0_i32 = arith.constant 0 : i32
    %c0_i32_0 = arith.constant 0 : i32
    return %arg0, %arg1, %c0_i32 : i32, i32, i32
  }
}

</mosaic_0001>

<bundles_post_ra>
// kernel: discriminator_forward.5
= control target key start
LH: loop header
LB: loop body
LE: loop exit
PB: predicated region body
PF: predicated region fallthrough
CT: control target
= control target key end

     0   :  { %s1193_s9 = smov 0   ;;  %s1195_s10 = smov 0   ;;  %s1306_s0 = inlined_call_operand.vmem [shape: bf16[2,256,128], index: 0, kind: input, shape index: {}]   ;;  %s1307_s1 = inlined_call_operand.vmem [shape: bf16[128,128], index: 1, kind: input, shape index: {}]   ;;  %s1308_s2 = inlined_call_operand.vmem [shape: f32[2,256,128], index: 2, kind: output, shape index: {}]  }
   0x1   :  { %s1197_s11 = smov 0  }
   0x2 LB: > { %s31_s12 = sadd.s32 1, %s1172_s10  ;;  %p985_p0 = scmp.ge.s32.totalorder %s1176_s11, 1  ;;  %s1176_s11 = sphi %s1197_s11, %s12_s11   ;;  %s1172_s10 = sphi %s1195_s10, %s1310_s10   ;;  %s1168_s9 = sphi %s1193_s9, %s1309_s9  }
   0x3   : > { %p33_p1 = scmp.ge.s32.totalorder %s31_s12, 2  ;;  %p156_p2 = scmp.lt.s32.totalorder %s1176_s11, 3 }
   0x5   : > { %s1312_s12 = smov (%p33_p1, %s31_s12), 0  ;;  %p157_p3 = pnand %p985_p0, %p156_p2 }
   0x6   : > { %v1130_v0 = vld [vmem:[%s1307_s1] sm:$0xff] (!%p157_p3)   ;;  %p195_p4 = scmp.lt.s32.totalorder (!%p157_p3), %s1168_s9, 1  ;;  %v1131_v1 = vld [vmem:[%s1307_s1 + $0x8] sm:$0xff] (!%p157_p3)   ;;  %v1132_v2 = vld [vmem:[%s1307_s1 + $0x10] sm:$0xff] (!%p157_p3)  }
   0x7   : > { %160 = sbr.rel (%p157_p3) target bundleno = 285 (0x11d), region = 28  ;;  %1042 = vmatprep.subr.bf16.mxu0 (!%p157_p3), %v1130_v0  ;;  %1090 = vmatprep.subr.bf16.mxu1 (!%p157_p3), %v1130_v0  ;;  %v1133_v3 = vld [vmem:[%s1307_s1 + $0x18] sm:$0xff] (!%p157_p3)   ;;  %v1134_v6 = vld [vmem:[%s1307_s1 + $0x20] sm:$0xff] (!%p157_p3)   ;;  %v1135_v7 = vld [vmem:[%s1307_s1 + $0x28] sm:$0xff] (!%p157_p3)  }
   0x8   : > { %1043 = vmatpush3.bf16.msra.mxu0 (!%p157_p3), %v1130_v0  ;;  %1098 = vmatpush3.bf16.msra.mxu1 (!%p157_p3), %v1130_v0  ;;  %v1136_v8 = vld [vmem:[%s1307_s1 + $0x30] sm:$0xff] (!%p157_p3)   ;;  %v1137_v9 = vld [vmem:[%s1307_s1 + $0x38] sm:$0xff] (!%p157_p3)  }
   0x9   : > { %1044 = vmatprep.subr.bf16.mxu0 (!%p157_p3), %v1131_v1  ;;  %1091 = vmatprep.subr.bf16.mxu1 (!%p157_p3), %v1131_v1 }
   0xc   : > { %1045 = vmatpush3.bf16.msra.mxu0 (!%p157_p3), %v1131_v1  ;;  %1099 = vmatpush3.bf16.msra.mxu1 (!%p157_p3), %v1131_v1 }
   0xd   : > { %1046 = vmatprep.subr.bf16.mxu0 (!%p157_p3), %v1132_v2  ;;  %1092 = vmatprep.subr.bf16.mxu1 (!%p157_p3), %v1132_v2 }
   0xe   : > { %s1314_s9 = smov (!%p195_p4, %s1168_s9), 1 }
   0xf   : > { %s1016_s19 = sshll.u32 %s1314_s9, 7  ;;  %s1017_s5 = sshll.u32 %s1314_s9, 8 }
  0x10   : > { %s1226_s22 = scalar_lea.vmem %s1306_s0, %s1016_s19  ;;  %1047 = vmatpush3.bf16.msra.mxu0 %v1132_v2  ;;  %1100 = vmatpush3.bf16.msra.mxu1 %v1132_v2  ;;  %s1263_s8 = scalar_lea.vmem %s1308_s2, %s1017_s5 }
  0x11   : > { %v1138_v4 = vld [vmem:[%s1226_s22] sm:$0xff]   ;;  %1048 = vmatprep.subr.bf16.mxu0 %v1133_v3  ;;  %1093 = vmatprep.subr.bf16.mxu1 %v1133_v3  ;;  %v1140_v10 = vld [vmem:[%s1226_s22 + $0x8] sm:$0xff]   ;;  %v1142_v12 = vld [vmem:[%s1226_s22 + $0x10] sm:$0xff]  }
  0x12   : > { %v1139_v5 = vld [vmem:[%s1226_s22 + $0x40] sm:$0xff]   ;;  %1058 = vmatprep.mubr.bf16.mxu0 %v1138_v4  ;;  %v1141_v11 = vld [vmem:[%s1226_s22 + $0x48] sm:$0xff]   ;;  %v1143_v13 = vld [vmem:[%s1226_s22 + $0x50] sm:$0xff]  }
  0x13   : > { %1074 = vmatprep.mubr.bf16.mxu1 %v1139_v5  ;;  %v1144_v14 = vld [vmem:[%s1226_s22 + $0x18] sm:$0xff]   ;;  %v1146_v16 = vld [vmem:[%s1226_s22 + $0x20] sm:$0xff]   ;;  %v1148_v18 = vld [vmem:[%s1226_s22 + $0x28] sm:$0xff]  }
  0x14   : > { %1049 = vmatpush3.bf16.msra.mxu0 %v1133_v3  ;;  %1101 = vmatpush3.bf16.msra.mxu1 %v1133_v3  ;;  %v1145_v15 = vld [vmem:[%s1226_s22 + $0x58] sm:$0xff]   ;;  %v1147_v17 = vld [vmem:[%s1226_s22 + $0x60] sm:$0xff]   ;;  %v1149_v19 = vld [vmem:[%s1226_s22 + $0x68] sm:$0xff]  }
  0x15   : > { %1050 = vmatprep.subr.bf16.mxu0 %v1134_v6  ;;  %1094 = vmatprep.subr.bf16.mxu1 %v1134_v6  ;;  %v1150_v20 = vld [vmem:[%s1226_s22 + $0x30] sm:$0xff]   ;;  %v1152_v22 = vld [vmem:[%s1226_s22 + $0x38] sm:$0xff]  }
  0x16   : > { %v1151_v21 = vld [vmem:[%s1226_s22 + $0x70] sm:$0xff]   ;;  %v1153_v23 = vld [vmem:[%s1226_s22 + $0x78] sm:$0xff]  }
  0x18   : > { %1051 = vmatpush3.bf16.msra.mxu0 %v1134_v6  ;;  %1102 = vmatpush3.bf16.msra.mxu1 %v1134_v6 }
  0x19   : > { %1052 = vmatprep.subr.bf16.mxu0 %v1135_v7  ;;  %1095 = vmatprep.subr.bf16.mxu1 %v1135_v7 }
  0x1c   : > { %1053 = vmatpush3.bf16.msra.mxu0 %v1135_v7  ;;  %1103 = vmatpush3.bf16.msra.mxu1 %v1135_v7 }
  0x1d   : > { %1054 = vmatprep.subr.bf16.mxu0 %v1136_v8  ;;  %1096 = vmatprep.subr.bf16.mxu1 %v1136_v8 }
  0x20   : > { %1055 = vmatpush3.bf16.msra.mxu0 %v1136_v8  ;;  %1104 = vmatpush3.bf16.msra.mxu1 %v1136_v8 }
  0x21   : > { %1056 = vmatprep.subr.bf16.mxu0 %v1137_v9  ;;  %1097 = vmatprep.subr.bf16.mxu1 %v1137_v9 }
  0x24   : > { %1057 = vmatpush3.bf16.msra.mxu0 %v1137_v9  ;;  %1105 = vmatpush3.bf16.msra.mxu1 %v1137_v9 }
  0x27   : > { %1059 = vmatmul.mubr.bf16.vlgmr.msra.gmra.mrb[0].mxu0 %v1140_v10  ;;  %1075 = vmatmul.mubr.bf16.vlgmr.msra.gmra.mrb[0].mxu1 %v1141_v11 }
  0x28   : > { %1062 = vmatprep.mubr.bf16.mxu0 %v1142_v12  ;;  %1078 = vmatprep.mubr.bf16.mxu1 %v1143_v13 }
  0x2f   : > { %1063 = vmatmul.mubr.bf16.gmra.mrb[4].mxu0 %v1144_v14  ;;  %1079 = vmatmul.mubr.bf16.gmra.mrb[4].mxu1 %v1145_v15 }
  0x30   : > { %1066 = vmatprep.mubr.bf16.mxu0 %v1146_v16  ;;  %1082 = vmatprep.mubr.bf16.mxu1 %v1147_v17 }
  0x37   : > { %1067 = vmatmul.mubr.bf16.gmra.mrb[8].mxu0 %v1148_v18  ;;  %1083 = vmatmul.mubr.bf16.gmra.mrb[8].mxu1 %v1149_v19 }
  0x38   : > { %1070 = vmatprep.mubr.bf16.mxu0 %v1150_v20  ;;  %1086 = vmatprep.mubr.bf16.mxu1 %v1151_v21 }
  0x3f   : > { %1071 = vmatmul.mubr.bf16.gmra.mrb[12].mxu0 %v1152_v22  ;;  %1087 = vmatmul.mubr.bf16.gmra.mrb[12].mxu1 %v1153_v23 }
  0xfa   : > { %v1060_v24 = vpop.f32.mrb[0].mxu0  ;;  %v1076_v25 = vpop.f32.mrb[0].mxu1 }
  0xfb   : > { %vm746_vm0 = vcmp.gt.f32.partialorder %v1060_v24, 0.0  ;;  %v778_v26 = vmul.f32 0.2, %v1060_v24  ;;  %vm762_vm1 = vcmp.gt.f32.partialorder %v1076_v25, 0.0  ;;  %v794_v27 = vmul.f32 0.2, %v1076_v25 }
  0xfc   : > { %v518_v28 = vpop.f32.mrb[1].mxu0  ;;  %v582_v29 = vpop.f32.mrb[1].mxu1 }
  0xfd   : > { %v810_v30 = vsel %vm746_vm0, %v1060_v24, %v778_v26  ;;  %v826_v31 = vsel %vm762_vm1, %v1076_v25, %v794_v27  ;;  %vm744_vm2 = vcmp.gt.f32.partialorder %v518_v28, 0.0  ;;  %v776_v32 = vmul.f32 0.2, %v518_v28  ;;  %v1061_v33 = vpop.f32.mrb[2].mxu0  ;;  %v1077_v34 = vpop.f32.mrb[2].mxu1 }
  0xfe   : > { %842 = vst [vmem:[%s1263_s8 + $0x10] sm:$0xff] %v810_v30  ;;  %858 = vst [vmem:[%s1263_s8 + $0x90] sm:$0xff] %v826_v31  ;;  %vm760_vm3 = vcmp.gt.f32.partialorder %v582_v29, 0.0  ;;  %v792_v35 = vmul.f32 0.2, %v582_v29  ;;  %vm747_vm4 = vcmp.gt.f32.partialorder %v1061_v33, 0.0 }
  0xff   : > { %v779_v36 = vmul.f32 0.2, %v1061_v33  ;;  %v808_v37 = vsel %vm744_vm2, %v518_v28, %v776_v32  ;;  %vm763_vm5 = vcmp.gt.f32.partialorder %v1077_v34, 0.0  ;;  %v795_v38 = vmul.f32 0.2, %v1077_v34  ;;  %v521_v39 = vpop.f32.mrb[3].mxu0 }
 0x100   : > { %v585_v40 = vpop.f32.mrb[3].mxu1  ;;  %840 = vst [vmem:[%s1263_s8] sm:$0xff] %v808_v37  ;;  %v824_v41 = vsel %vm760_vm3, %v582_v29, %v792_v35  ;;  %vm745_vm6 = vcmp.gt.f32.partialorder %v521_v39, 0.0  ;;  %v777_v43 = vmul.f32 0.2, %v521_v39 }
 0x101   : > { %v811_v42 = vsel %vm747_vm4, %v1061_v33, %v779_v36  ;;  %856 = vst [vmem:[%s1263_s8 + $0x80] sm:$0xff] %v824_v41  ;;  %v827_v44 = vsel %vm763_vm5, %v1077_v34, %v795_v38  ;;  %vm761_vm7 = vcmp.gt.f32.partialorder %v585_v40, 0.0  ;;  %v793_v45 = vmul.f32 0.2, %v585_v40 }
 0x102   : > { %843 = vst [vmem:[%s1263_s8 + $0x18] sm:$0xff] %v811_v42  ;;  %859 = vst [vmem:[%s1263_s8 + $0x98] sm:$0xff] %v827_v44  ;;  %v809_v46 = vsel %vm745_vm6, %v521_v39, %v777_v43  ;;  %v1064_v47 = vpop.f32.mrb[4].mxu0  ;;  %v1080_v48 = vpop.f32.mrb[4].mxu1 }
 0x103   : > { %841 = vst [vmem:[%s1263_s8 + $0x8] sm:$0xff] %v809_v46  ;;  %v825_v49 = vsel %vm761_vm7, %v585_v40, %v793_v45  ;;  %vm750_vm8 = vcmp.gt.f32.partialorder %v1064_v47, 0.0  ;;  %v782_v50 = vmul.f32 0.2, %v1064_v47  ;;  %vm766_vm9 = vcmp.gt.f32.partialorder %v1080_v48, 0.0  ;;  %v534_v51 = vpop.f32.mrb[5].mxu0 }
 0x104   : > { %v598_v52 = vpop.f32.mrb[5].mxu1  ;;  %857 = vst [vmem:[%s1263_s8 + $0x88] sm:$0xff] %v825_v49  ;;  %v798_v53 = vmul.f32 0.2, %v1080_v48  ;;  %vm748_vm10 = vcmp.gt.f32.partialorder %v534_v51, 0.0  ;;  %v1065_v57 = vpop.f32.mrb[6].mxu0 }
 0x105   : > { %v780_v54 = vmul.f32 0.2, %v534_v51  ;;  %vm764_vm11 = vcmp.gt.f32.partialorder %v598_v52, 0.0  ;;  %v814_v55 = vsel %vm750_vm8, %v1064_v47, %v782_v50  ;;  %v796_v56 = vmul.f32 0.2, %v598_v52  ;;  %v1081_v58 = vpop.f32.mrb[6].mxu1 }
 0x106   : > { %846 = vst [vmem:[%s1263_s8 + $0x30] sm:$0xff] %v814_v55  ;;  %v830_v59 = vsel %vm766_vm9, %v1080_v48, %v798_v53  ;;  %vm751_vm12 = vcmp.gt.f32.partialorder %v1065_v57, 0.0  ;;  %v783_v61 = vmul.f32 0.2, %v1065_v57  ;;  %v537_v62 = vpop.f32.mrb[7].mxu0  ;;  %v601_v63 = vpop.f32.mrb[7].mxu1 }
 0x107   : > { %v812_v60 = vsel %vm748_vm10, %v534_v51, %v780_v54  ;;  %862 = vst [vmem:[%s1263_s8 + $0xb0] sm:$0xff] %v830_v59  ;;  %v828_v0 = vsel %vm764_vm11, %v598_v52, %v796_v56  ;;  %vm767_vm13 = vcmp.gt.f32.partialorder %v1081_v58, 0.0  ;;  %v799_v1 = vmul.f32 0.2, %v1081_v58 }
 0x108   : > { %844 = vst [vmem:[%s1263_s8 + $0x20] sm:$0xff] %v812_v60  ;;  %vm749_vm14 = vcmp.gt.f32.partialorder %v537_v62, 0.0  ;;  %860 = vst [vmem:[%s1263_s8 + $0xa0] sm:$0xff] %v828_v0  ;;  %v815_v2 = vsel %vm751_vm12, %v1065_v57, %v783_v61  ;;  %v781_v3 = vmul.f32 0.2, %v537_v62  ;;  %vm765_vm15 = vcmp.gt.f32.partialorder %v601_v63, 0.0 }
 0x109   : > { %v797_v4 = vmul.f32 0.2, %v601_v63  ;;  %847 = vst [vmem:[%s1263_s8 + $0x38] sm:$0xff] %v815_v2  ;;  %v831_v5 = vsel %vm767_vm13, %v1081_v58, %v799_v1 }
 0x10a   : > { %863 = vst [vmem:[%s1263_s8 + $0xb8] sm:$0xff] %v831_v5  ;;  %v813_v6 = vsel %vm749_vm14, %v537_v62, %v781_v3  ;;  %v1068_v8 = vpop.f32.mrb[8].mxu0  ;;  %v1084_v9 = vpop.f32.mrb[8].mxu1 }
 0x10b   : > { %v829_v7 = vsel %vm765_vm15, %v601_v63, %v797_v4  ;;  %845 = vst [vmem:[%s1263_s8 + $0x28] sm:$0xff] %v813_v6  ;;  %vm754_vm0 = vcmp.gt.f32.partialorder %v1068_v8, 0.0  ;;  %v786_v10 = vmul.f32 0.2, %v1068_v8  ;;  %vm770_vm1 = vcmp.gt.f32.partialorder %v1084_v9, 0.0  ;;  %v550_v12 = vpop.f32.mrb[9].mxu0 }
 0x10c   : > { %861 = vst [vmem:[%s1263_s8 + $0xa8] sm:$0xff] %v829_v7  ;;  %v802_v11 = vmul.f32 0.2, %v1084_v9  ;;  %v614_v13 = vpop.f32.mrb[9].mxu1  ;;  %vm752_vm2 = vcmp.gt.f32.partialorder %v550_v12, 0.0  ;;  %v1069_v17 = vpop.f32.mrb[10].mxu0 }
 0x10d   : > { %v818_v14 = vsel %vm754_vm0, %v1068_v8, %v786_v10  ;;  %v784_v16 = vmul.f32 0.2, %v550_v12  ;;  %v1085_v18 = vpop.f32.mrb[10].mxu1  ;;  %vm768_vm3 = vcmp.gt.f32.partialorder %v614_v13, 0.0  ;;  %v800_v19 = vmul.f32 0.2, %v614_v13 }
 0x10e   : > { %v834_v15 = vsel %vm770_vm1, %v1084_v9, %v802_v11  ;;  %850 = vst [vmem:[%s1263_s8 + $0x50] sm:$0xff] %v818_v14  ;;  %vm755_vm4 = vcmp.gt.f32.partialorder %v1069_v17, 0.0  ;;  %v787_v20 = vmul.f32 0.2, %v1069_v17  ;;  %vm771_vm5 = vcmp.gt.f32.partialorder %v1085_v18, 0.0  ;;  %v553_v23 = vpop.f32.mrb[11].mxu0 }
 0x10f   : > { %866 = vst [vmem:[%s1263_s8 + $0xd0] sm:$0xff] %v834_v15  ;;  %v816_v21 = vsel %vm752_vm2, %v550_v12, %v784_v16  ;;  %v803_v22 = vmul.f32 0.2, %v1085_v18  ;;  %v617_v24 = vpop.f32.mrb[11].mxu1  ;;  %v832_v25 = vsel %vm768_vm3, %v614_v13, %v800_v19  ;;  %vm753_vm6 = vcmp.gt.f32.partialorder %v553_v23, 0.0 }
 0x110   : > { %848 = vst [vmem:[%s1263_s8 + $0x40] sm:$0xff] %v816_v21  ;;  %v819_v26 = vsel %vm755_vm4, %v1069_v17, %v787_v20  ;;  %v785_v27 = vmul.f32 0.2, %v553_v23  ;;  %864 = vst [vmem:[%s1263_s8 + $0xc0] sm:$0xff] %v832_v25  ;;  %vm769_vm7 = vcmp.gt.f32.partialorder %v617_v24, 0.0 }
 0x111   : > { %851 = vst [vmem:[%s1263_s8 + $0x58] sm:$0xff] %v819_v26  ;;  %v835_v28 = vsel %vm771_vm5, %v1085_v18, %v803_v22  ;;  %v801_v29 = vmul.f32 0.2, %v617_v24 }
 0x112   : > { %867 = vst [vmem:[%s1263_s8 + $0xd8] sm:$0xff] %v835_v28  ;;  %v817_v30 = vsel %vm753_vm6, %v553_v23, %v785_v27  ;;  %v1072_v31 = vpop.f32.mrb[12].mxu0  ;;  %v1088_v32 = vpop.f32.mrb[12].mxu1 }
 0x113   : > { %849 = vst [vmem:[%s1263_s8 + $0x48] sm:$0xff] %v817_v30  ;;  %v833_v33 = vsel %vm769_vm7, %v617_v24, %v801_v29  ;;  %vm758_vm8 = vcmp.gt.f32.partialorder %v1072_v31, 0.0  ;;  %v790_v34 = vmul.f32 0.2, %v1072_v31  ;;  %vm774_vm9 = vcmp.gt.f32.partialorder %v1088_v32, 0.0  ;;  %v566_v35 = vpop.f32.mrb[13].mxu0 }
 0x114   : > { %v630_v36 = vpop.f32.mrb[13].mxu1  ;;  %865 = vst [vmem:[%s1263_s8 + $0xc8] sm:$0xff] %v833_v33  ;;  %v806_v37 = vmul.f32 0.2, %v1088_v32  ;;  %vm756_vm10 = vcmp.gt.f32.partialorder %v566_v35, 0.0  ;;  %v1073_v41 = vpop.f32.mrb[14].mxu0 }
 0x115   : > { %v788_v38 = vmul.f32 0.2, %v566_v35  ;;  %vm772_vm11 = vcmp.gt.f32.partialorder %v630_v36, 0.0  ;;  %v822_v39 = vsel %vm758_vm8, %v1072_v31, %v790_v34  ;;  %v804_v40 = vmul.f32 0.2, %v630_v36  ;;  %v1089_v42 = vpop.f32.mrb[14].mxu1 }
 0x116   : > { %854 = vst [vmem:[%s1263_s8 + $0x70] sm:$0xff] %v822_v39  ;;  %v838_v43 = vsel %vm774_vm9, %v1088_v32, %v806_v37  ;;  %vm759_vm12 = vcmp.gt.f32.partialorder %v1073_v41, 0.0  ;;  %v791_v45 = vmul.f32 0.2, %v1073_v41  ;;  %v569_v46 = vpop.f32.mrb[15].mxu0  ;;  %v633_v47 = vpop.f32.mrb[15].mxu1 }
 0x117   : > { %v820_v44 = vsel %vm756_vm10, %v566_v35, %v788_v38  ;;  %870 = vst [vmem:[%s1263_s8 + $0xf0] sm:$0xff] %v838_v43  ;;  %v836_v48 = vsel %vm772_vm11, %v630_v36, %v804_v40  ;;  %vm775_vm13 = vcmp.gt.f32.partialorder %v1089_v42, 0.0  ;;  %v807_v49 = vmul.f32 0.2, %v1089_v42 }
 0x118   : > { %852 = vst [vmem:[%s1263_s8 + $0x60] sm:$0xff] %v820_v44  ;;  %vm757_vm14 = vcmp.gt.f32.partialorder %v569_v46, 0.0  ;;  %868 = vst [vmem:[%s1263_s8 + $0xe0] sm:$0xff] %v836_v48  ;;  %v823_v50 = vsel %vm759_vm12, %v1073_v41, %v791_v45  ;;  %v789_v51 = vmul.f32 0.2, %v569_v46  ;;  %vm773_vm15 = vcmp.gt.f32.partialorder %v633_v47, 0.0 }
 0x119   : > { %v805_v52 = vmul.f32 0.2, %v633_v47  ;;  %855 = vst [vmem:[%s1263_s8 + $0x78] sm:$0xff] %v823_v50  ;;  %v839_v53 = vsel %vm775_vm13, %v1089_v42, %v807_v49 }
 0x11a   : > { %871 = vst [vmem:[%s1263_s8 + $0xf8] sm:$0xff] %v839_v53  ;;  %v821_v54 = vsel %vm757_vm14, %v569_v46, %v789_v51 }
 0x11b   : > { %v837_v55 = vsel %vm773_vm15, %v633_v47, %v805_v52  ;;  %853 = vst [vmem:[%s1263_s8 + $0x68] sm:$0xff] %v821_v54 }
 0x11c   : > { %869 = vst [vmem:[%s1263_s8 + $0xe8] sm:$0xff] %v837_v55 }
 0x11d PF: > { %s12_s11 = sadd.s32 1, %s1176_s11   ;;  %s1309_s9 = smov %s1172_s10 }
 0x11e   : > { %p9_p5 = scmp.ge.s32.totalorder %s12_s11, 4   ;;  %s1310_s10 = smov %s1312_s12 }
 0x120   :  { %11 = sbr.rel (!%p9_p5) target bundleno = 2 (0x2), region = 69 }

// kernel: discriminator_forward.6
= control target key start
LH: loop header
LB: loop body
LE: loop exit
PB: predicated region body
PF: predicated region fallthrough
CT: control target
= control target key end

     0   :  { %s1319_s9 = smov 0   ;;  %s1321_s10 = smov 0   ;;  %s1494_s0 = inlined_call_operand.vmem [shape: bf16[2,64,1024], index: 0, kind: input, shape index: {}]   ;;  %s1495_s1 = inlined_call_operand.vmem [shape: bf16[1024,128], index: 1, kind: input, shape index: {}]   ;;  %s1496_s2 = inlined_call_operand.vmem [shape: f32[2,64,128], index: 2, kind: output, shape index: {}]  }
   0x1   :  { %s1323_s11 = smov 0   ;;  %s1325_s12 = smov 0  }
   0x2   :  { %s1327_s13 = smov 0   ;;  %s1329_s14 = smov 0  }
   0x3   :  { %s1331_s15 = smov 0  }
   0x4 LB: > { %s24_s16 = sadd.s32 1, %s1293_s13  ;;  %s31_s17 = sadd.s32 1, %s1297_s14  ;;  %s1301_s15 = sphi %s1331_s15, %s12_s15   ;;  %s1297_s14 = sphi %s1329_s14, %s1502_s14   ;;  %s1293_s13 = sphi %s1327_s13, %s1501_s13   ;;  %s1289_s12 = sphi %s1325_s12, %s1500_s12   ;;  %s1285_s11 = sphi %s1323_s11, %s1499_s11   ;;  %s1281_s10 = sphi %s1321_s10, %s1498_s10   ;;  %s1277_s9 = sphi %s1319_s9, %s1497_s9  }
   0x5   : > { %p25_p0 = scmp.ge.s32.totalorder %s24_s16, 2  ;;  %p49_p1 = scmp.ne.s32.totalorder %s1281_s10, %s1277_s9 }
   0x6   : > { %p50_p2 = scmp.eq.s32.totalorder %s1301_s15, 0  ;;  %s42_s21 = sadd.s32 1, %s1281_s10 }
   0x7   : > { %s1504_s16 = smov (%p25_p0, %s24_s16), 0  ;;  %s1506_s17 = smov (!%p25_p0, %s31_s17), %s1297_s14 }
   0x8   : > { %p51_p3 = por %p50_p2, %p49_p1  ;;  %p33_p4 = scmp.ge.s32.totalorder %s1506_s17, 2 }
   0x9   : > { %s38_s18 = ssub.s32 %s1293_s13, %s1504_s16  ;;  %p988_p6 = scmp.ge.s32.totalorder %s1301_s15, 4 }
   0xa   : > { %s1508_s17 = smov (%p33_p4, %s1506_s17), 0 }
   0xb   : > { %s35_s19 = ssub.s32 %s1297_s14, %s1508_s17  ;;  %129 = sbr.rel (%p988_p6) target bundleno = 33 (0x21), region = 16 }
   0xc   : > { %s39_s20 = sor.u32 %s38_s18, %s35_s19 }
   0xd   : > { %p40_p5 = scmp.eq.s32.totalorder %s39_s20, 0 }
   0xf   : > { %s1370_s22 = scalar_select %p40_p5, %s1281_s10, %s42_s21  }
  0x12   : > { %132 = sbr.rel (!%p51_p3) target bundleno = 33 (0x21), region = 20  ;;  %s134_s23 = sand.u32 (%p51_p3), 1, %s1281_s10  }
  0x13   : > { %s990_s24 = sshll.u32 (%p51_p3), %s1293_s13, 2  ;;  %s989_s25 = sshll.u32 (%p51_p3), %s134_s23, 7 }
  0x14   : > { %s991_s26 = sshll.u32 (%p51_p3), %s1297_s14, 6  ;;  %s136_s4 = scalar_lea.vmem (%p51_p3), [#allocation3], %s989_s25 }
  0x15   : > { %s142_s27 = sadd.s32 (%p51_p3), %s991_s26, %s990_s24 }
  0x16   : > { %s992_s28 = sshll.u32 (%p51_p3), %s142_s27, 2 }
  0x17   : > { %s1379_s3 = scalar_lea.vmem (%p51_p3), %s1494_s0, %s992_s28 }
  0x18   : > { %v157_v0 = vld [vmem:[%s1379_s3] sm:$0xff] (%p51_p3)  ;;  %v159_v1 = vld [vmem:[%s1379_s3 + $0x8] sm:$0xff] (%p51_p3) }
  0x19   : > { %v161_v2 = vld [vmem:[%s1379_s3 + $0x20] sm:$0xff]  ;;  %158 = vst [vmem:[%s136_s4] sm:$0xff] %v157_v0  ;;  %160 = vst [vmem:[%s136_s4 + $0x8] sm:$0xff] %v159_v1  ;;  %v163_v3 = vld [vmem:[%s1379_s3 + $0x28] sm:$0xff] }
  0x1a   : > { %162 = vst [vmem:[%s136_s4 + $0x10] sm:$0xff] %v161_v2  ;;  %v165_v4 = vld [vmem:[%s1379_s3 + $0x40] sm:$0xff]  ;;  %v167_v5 = vld [vmem:[%s1379_s3 + $0x48] sm:$0xff]  ;;  %164 = vst [vmem:[%s136_s4 + $0x18] sm:$0xff] %v163_v3 }
  0x1b   : > { %166 = vst [vmem:[%s136_s4 + $0x20] sm:$0xff] %v165_v4  ;;  %168 = vst [vmem:[%s136_s4 + $0x28] sm:$0xff] %v167_v5  ;;  %v169_v6 = vld [vmem:[%s1379_s3 + $0x60] sm:$0xff]  ;;  %v171_v7 = vld [vmem:[%s1379_s3 + $0x68] sm:$0xff] }
  0x1c   : > { %v173_v8 = vld [vmem:[%s1379_s3 + $0x80] sm:$0xff]  ;;  %170 = vst [vmem:[%s136_s4 + $0x30] sm:$0xff] %v169_v6  ;;  %172 = vst [vmem:[%s136_s4 + $0x38] sm:$0xff] %v171_v7  ;;  %v175_v9 = vld [vmem:[%s1379_s3 + $0x88] sm:$0xff] }
  0x1d   : > { %174 = vst [vmem:[%s136_s4 + $0x40] sm:$0xff] %v173_v8  ;;  %v177_v10 = vld [vmem:[%s1379_s3 + $0xa0] sm:$0xff]  ;;  %v179_v11 = vld [vmem:[%s1379_s3 + $0xa8] sm:$0xff]  ;;  %176 = vst [vmem:[%s136_s4 + $0x48] sm:$0xff] %v175_v9 }
  0x1e   : > { %178 = vst [vmem:[%s136_s4 + $0x50] sm:$0xff] %v177_v10  ;;  %180 = vst [vmem:[%s136_s4 + $0x58] sm:$0xff] %v179_v11  ;;  %v181_v12 = vld [vmem:[%s1379_s3 + $0xc0] sm:$0xff]  ;;  %v183_v13 = vld [vmem:[%s1379_s3 + $0xc8] sm:$0xff] }
  0x1f   : > { %v185_v14 = vld [vmem:[%s1379_s3 + $0xe0] sm:$0xff]  ;;  %182 = vst [vmem:[%s136_s4 + $0x60] sm:$0xff] %v181_v12  ;;  %184 = vst [vmem:[%s136_s4 + $0x68] sm:$0xff] %v183_v13  ;;  %v187_v15 = vld [vmem:[%s1379_s3 + $0xe8] sm:$0xff] }
  0x20   : > { %186 = vst [vmem:[%s136_s4 + $0x70] sm:$0xff] %v185_v14  ;;  %188 = vst [vmem:[%s136_s4 + $0x78] sm:$0xff] %v187_v15 }
  0x21 PF: > { %p993_p7 = scmp.ge.s32.totalorder %s1301_s15, 1  ;;  %p202_p8 = scmp.lt.s32.totalorder %s1301_s15, 5 }
  0x23   : > { %p203_p9 = pnand %p993_p7, %p202_p8 }
  0x24   : > { %s209_s5 = sand.u32 (!%p203_p9), 1, %s1277_s9   ;;  %s995_s6 = sshll.u32 (!%p203_p9), %s1285_s11, 6 }
  0x25   : > { %206 = sbr.rel (%p203_p9) target bundleno = 414 (0x19e), region = 47  ;;  %s994_s7 = sshll.u32 (!%p203_p9), %s209_s5, 7 }
  0x26   : > { %p242_p10 = scmp.lt.s32.totalorder (!%p203_p9), %s995_s6, 127  ;;  %p248_p11 = scmp.lt.s32.totalorder (!%p203_p9), %s1289_s12, 1 }
  0x27   : > { %s1413_s26 = scalar_lea.vmem (!%p203_p9), [#allocation3], %s994_s7  ;;  %p999_p12 = scmp.ne.s32.totalorder (!%p203_p9), %s1285_s11, 0 }
  0x2c   : > { %s1510_s6 = smov (!%p242_p10, %s995_s6), 127  ;;  %s1512_s12 = smov (!%p248_p11, %s1289_s12), 1 }
  0x2d   : > { %s996_s8 = sshll.u32 %s1510_s6, 2  ;;  %s1051_s21 = sshll.u32 %s1512_s12, 6  ;;  %v1303_v16 = vmov (!%p999_p12), 0.0  }
  0x2e   : > { %s1406_s20 = scalar_lea.vmem %s1495_s1, %s996_s8  ;;  %s1411_s25 = scalar_lea.vmem %s1496_s2, %s1051_s21  ;;  %262 = vst [vmem:[#allocation2] sm:$0xff] (!%p999_p12), %v1303_v16  ;;  %263 = vst [vmem:[#allocation2 + $0x8] sm:$0xff] (!%p999_p12), %v1303_v16 }
  0x2f   : > { %261 = sbr.rel (%p999_p12) target bundleno = 54 (0x36), region = 55  ;;  %264 = vst [vmem:[#allocation2 + $0x10] sm:$0xff] (!%p999_p12), %v1303_v16  ;;  %265 = vst [vmem:[#allocation2 + $0x18] sm:$0xff] (!%p999_p12), %v1303_v16 }
  0x30   : > { %266 = vst [vmem:[#allocation2 + $0x20] sm:$0xff] (!%p999_p12), %v1303_v16  ;;  %267 = vst [vmem:[#allocation2 + $0x28] sm:$0xff] (!%p999_p12), %v1303_v16 }
  0x31   : > { %268 = vst [vmem:[#allocation2 + $0x30] sm:$0xff] (!%p999_p12), %v1303_v16  ;;  %269 = vst [vmem:[#allocation2 + $0x38] sm:$0xff] (!%p999_p12), %v1303_v16 }
  0x36 PF: > { %v1189_v17 = vld [vmem:[%s1406_s20 + $0x40] sm:$0xff]   ;;  %v1193_v21 = vld [vmem:[%s1406_s20 + $0x48] sm:$0xff]   ;;  %v1197_v25 = vld [vmem:[%s1406_s20 + $0x50] sm:$0xff]   ;;  %p1048_p13 = scmp.ne.s32.totalorder %s1285_s11, 1 }
  0x37   : > { %v1190_v18 = vld [vmem:[%s1406_s20 + $0xc0] sm:$0xff]   ;;  %1052 = vmatprep.subr.bf16.mxu0 %v1189_v17  ;;  %v1194_v22 = vld [vmem:[%s1406_s20 + $0xc8] sm:$0xff]   ;;  %v1198_v26 = vld [vmem:[%s1406_s20 + $0xd0] sm:$0xff]  }
  0x38   : > { %v1191_v19 = vld [vmem:[%s1406_s20] sm:$0xff]   ;;  %1092 = vmatprep.subr.bf16.mxu1 %v1190_v18  ;;  %v1195_v23 = vld [vmem:[%s1406_s20 + $0x8] sm:$0xff]   ;;  %v1199_v27 = vld [vmem:[%s1406_s20 + $0x10] sm:$0xff]  }
  0x39   : > { %v1192_v20 = vld [vmem:[%s1406_s20 + $0x80] sm:$0xff]   ;;  %1053 = vmatpush3.bf16.msra.mxu0 %v1191_v19  ;;  %v1196_v24 = vld [vmem:[%s1406_s20 + $0x88] sm:$0xff]   ;;  %v1200_v28 = vld [vmem:[%s1406_s20 + $0x90] sm:$0xff]  }
  0x3a   : > { %1093 = vmatpush3.bf16.msra.mxu1 %v1192_v20  ;;  %1054 = vmatprep.subr.bf16.mxu0 %v1193_v21  ;;  %v1201_v29 = vld [vmem:[%s1406_s20 + $0x58] sm:$0xff]   ;;  %v1205_v33 = vld [vmem:[%s1406_s20 + $0x60] sm:$0xff]   ;;  %v1209_v37 = vld [vmem:[%s1406_s20 + $0x68] sm:$0xff]  }
  0x3b   : > { %1094 = vmatprep.subr.bf16.mxu1 %v1194_v22  ;;  %v1202_v30 = vld [vmem:[%s1406_s20 + $0xd8] sm:$0xff]   ;;  %v1206_v34 = vld [vmem:[%s1406_s20 + $0xe0] sm:$0xff]   ;;  %v1210_v38 = vld [vmem:[%s1406_s20 + $0xe8] sm:$0xff]  }
  0x3c   : > { %v1203_v31 = vld [vmem:[%s1406_s20 + $0x18] sm:$0xff]   ;;  %v1207_v35 = vld [vmem:[%s1406_s20 + $0x20] sm:$0xff]   ;;  %v1211_v39 = vld [vmem:[%s1406_s20 + $0x28] sm:$0xff]  }
  0x3d   : > { %1055 = vmatpush3.bf16.msra.mxu0 %v1195_v23  ;;  %v1204_v32 = vld [vmem:[%s1406_s20 + $0x98] sm:$0xff]   ;;  %v1208_v36 = vld [vmem:[%s1406_s20 + $0xa0] sm:$0xff]   ;;  %v1212_v40 = vld [vmem:[%s1406_s20 + $0xa8] sm:$0xff]  }
  0x3e   : > { %1095 = vmatpush3.bf16.msra.mxu1 %v1196_v24  ;;  %1056 = vmatprep.subr.bf16.mxu0 %v1197_v25  ;;  %v1213_v41 = vld [vmem:[%s1406_s20 + $0x70] sm:$0xff]   ;;  %v1217_v45 = vld [vmem:[%s1406_s20 + $0x78] sm:$0xff]   ;;  %v270_v10 = vld [vmem:[#allocation2] sm:$0xff] }
  0x3f   : > { %1096 = vmatprep.subr.bf16.mxu1 %v1198_v26  ;;  %v1214_v42 = vld [vmem:[%s1406_s20 + $0xf0] sm:$0xff]   ;;  %v1218_v46 = vld [vmem:[%s1406_s20 + $0xf8] sm:$0xff]   ;;  %v271_v15 = vld [vmem:[#allocation2 + $0x8] sm:$0xff] }
  0x40   : > { %v1215_v43 = vld [vmem:[%s1406_s20 + $0x30] sm:$0xff]   ;;  %v1219_v47 = vld [vmem:[%s1406_s20 + $0x38] sm:$0xff]  }
  0x41   : > { %1057 = vmatpush3.bf16.msra.mxu0 %v1199_v27  ;;  %v1216_v44 = vld [vmem:[%s1406_s20 + $0xb0] sm:$0xff]   ;;  %v1220_v48 = vld [vmem:[%s1406_s20 + $0xb8] sm:$0xff]  }
  0x42   : > { %1097 = vmatpush3.bf16.msra.mxu1 %v1200_v28  ;;  %1058 = vmatprep.subr.bf16.mxu0 %v1201_v29  ;;  %v1221_v49 = vld [vmem:[%s1413_s26] ss:$16 sps:$4 sm:$0xff]   ;;  %v1223_v50 = vld [vmem:[%s1413_s26 + $0x4] ss:$16 sps:$4 sm:$0xff]   ;;  %v1224_v51 = vld [vmem:[%s1413_s26 + $0x8] ss:$16 sps:$4 sm:$0xff]  }
  0x43   : > { %1098 = vmatprep.subr.bf16.mxu1 %v1202_v30  ;;  %v1226_v52 = vld [vmem:[%s1413_s26 + $0xc] ss:$16 sps:$4 sm:$0xff]   ;;  %662 = vmatprep.mubr.bf16.mxu0 %v1223_v50  ;;  %v1227_v53 = vld [vmem:[%s1413_s26 + $0x24] ss:$16 sps:$4 sm:$0xff]   ;;  %v1231_v55 = vld [vmem:[%s1413_s26 + $0x20] ss:$16 sps:$4 sm:$0xff]  }
  0x44   : > { %727 = vmatprep.mubr.bf16.mxu1 %v1226_v52  ;;  %v1229_v54 = vld [vmem:[%s1413_s26 + $0x2c] ss:$16 sps:$4 sm:$0xff]   ;;  %v1232_v56 = vld [vmem:[%s1413_s26 + $0x28] ss:$16 sps:$4 sm:$0xff]   ;;  %v1233_v57 = vld [vmem:[%s1413_s26 + $0x44] ss:$16 sps:$4 sm:$0xff]  }
  0x45   : > { %1059 = vmatpush3.bf16.msra.mxu0 %v1203_v31  ;;  %v1235_v58 = vld [vmem:[%s1413_s26 + $0x4c] ss:$16 sps:$4 sm:$0xff]   ;;  %v1237_v59 = vld [vmem:[%s1413_s26 + $0x40] ss:$16 sps:$4 sm:$0xff]   ;;  %v1238_v60 = vld [vmem:[%s1413_s26 + $0x48] ss:$16 sps:$4 sm:$0xff]  }
  0x46   : > { %1099 = vmatpush3.bf16.msra.mxu1 %v1204_v32  ;;  %1060 = vmatprep.subr.bf16.mxu0 %v1205_v33  ;;  %v1239_v61 = vld [vmem:[%s1413_s26 + $0x64] ss:$16 sps:$4 sm:$0xff]   ;;  %v1241_v62 = vld [vmem:[%s1413_s26 + $0x6c] ss:$16 sps:$4 sm:$0xff]   ;;  %v1243_v63 = vld [vmem:[%s1413_s26 + $0x60] ss:$16 sps:$4 sm:$0xff]  }
  0x47   : > { %1100 = vmatprep.subr.bf16.mxu1 %v1206_v34  ;;  %v1244_v0 = vld [vmem:[%s1413_s26 + $0x68] ss:$16 sps:$4 sm:$0xff]   ;;  %v272_v28 = vld [vmem:[#allocation2 + $0x10] sm:$0xff] }
  0x48   : > { %v273_v33 = vld [vmem:[#allocation2 + $0x18] sm:$0xff] }
  0x49   : > { %1061 = vmatpush3.bf16.msra.mxu0 %v1207_v35 }
  0x4a   : > { %1101 = vmatpush3.bf16.msra.mxu1 %v1208_v36  ;;  %1062 = vmatprep.subr.bf16.mxu0 %v1209_v37 }
  0x4b   : > { %1102 = vmatprep.subr.bf16.mxu1 %v1210_v38 }
  0x4d   : > { %1063 = vmatpush3.bf16.msra.mxu0 %v1211_v39 }
  0x4e   : > { %1103 = vmatpush3.bf16.msra.mxu1 %v1212_v40  ;;  %1064 = vmatprep.subr.bf16.mxu0 %v1213_v41 }
  0x4f   : > { %1104 = vmatprep.subr.bf16.mxu1 %v1214_v42 }
  0x51   : > { %1065 = vmatpush3.bf16.msra.mxu0 %v1215_v43 }
  0x52   : > { %1105 = vmatpush3.bf16.msra.mxu1 %v1216_v44  ;;  %1066 = vmatprep.subr.bf16.mxu0 %v1217_v45 }
  0x53   : > { %1106 = vmatprep.subr.bf16.mxu1 %v1218_v46  ;;  %v274_v46 = vld [vmem:[#allocation2 + $0x20] sm:$0xff] }
  0x55   : > { %1067 = vmatpush3.bf16.msra.mxu0 %v1219_v47 }
  0x56   : > { %1107 = vmatpush3.bf16.msra.mxu1 %v1220_v48 }
  0x58   : > { %663 = vmatmul.mubr.bf16.vlgmr.msra.gmra.mrb[0].mxu0 %v1221_v49 }
  0x59   : > { %728 = vmatmul.mubr.bf16.vlgmr.msra.gmra.mrb[0].mxu1 %v1224_v51  ;;  %670 = vmatprep.mubr.bf16.mxu0 %v1227_v53  ;;  %v275_v51 = vld [vmem:[#allocation2 + $0x28] sm:$0xff] }
  0x5a   : > { %735 = vmatprep.mubr.bf16.mxu1 %v1229_v54 }
  0x60   : > { %671 = vmatmul.mubr.bf16.gmra.mrb[4].mxu0 %v1231_v55 }
  0x61   : > { %736 = vmatmul.mubr.bf16.gmra.mrb[4].mxu1 %v1232_v56  ;;  %678 = vmatprep.mubr.bf16.mxu0 %v1233_v57 }
  0x62   : > { %743 = vmatprep.mubr.bf16.mxu1 %v1235_v58 }
  0x68   : > { %679 = vmatmul.mubr.bf16.gmra.mrb[8].mxu0 %v1237_v59 }
  0x69   : > { %744 = vmatmul.mubr.bf16.gmra.mrb[8].mxu1 %v1238_v60  ;;  %686 = vmatprep.mubr.bf16.mxu0 %v1239_v61 }
  0x6a   : > { %751 = vmatprep.mubr.bf16.mxu1 %v1241_v62 }
  0x70   : > { %687 = vmatmul.mubr.bf16.gmra.mrb[12].mxu0 %v1243_v63 }
  0x71   : > { %752 = vmatmul.mubr.bf16.gmra.mrb[12].mxu1 %v1244_v0  ;;  %v276_v0 = vld [vmem:[#allocation2 + $0x30] sm:$0xff] }
 0x12b   : > { %v1068_v1 = vpop.f32.mrb[0].mxu0 }
 0x12c   : > { %v1108_v2 = vpop.f32.mrb[0].mxu1  ;;  %v1069_v3 = vpop.f32.mrb[1].mxu0 }
 0x12d   : > { %v1070_v4 = vadd.f32 %v1069_v3, %v1068_v1  ;;  %v1109_v5 = vpop.f32.mrb[1].mxu1  ;;  %v1071_v6 = vpop.f32.mrb[2].mxu0 }
 0x12e   : > { %v1110_v7 = vadd.f32 %v1109_v5, %v1108_v2  ;;  %v1111_v8 = vpop.f32.mrb[2].mxu1  ;;  %v1072_v9 = vpop.f32.mrb[3].mxu0  ;;  %v277_v5 = vld [vmem:[#allocation2 + $0x38] sm:$0xff] }
 0x12f   : > { %v1073_v11 = vadd.f32 %v1072_v9, %v1071_v6  ;;  %v1112_v12 = vpop.f32.mrb[3].mxu1 }
 0x130   : > { %v730_v13 = vadd.f32 %v1110_v7, %v1070_v4  ;;  %v1113_v14 = vadd.f32 %v1112_v12, %v1111_v8 }
 0x132   : > { %v760_v16 = vadd.f32 %v730_v13, %v270_v10  ;;  %v733_v17 = vadd.f32 %v1113_v14, %v1073_v11 }
 0x133   : > { %v1074_v18 = vpop.f32.mrb[4].mxu0 }
 0x134   : > { %768 = vst [vmem:[#allocation2] sm:$0xff] %v760_v16  ;;  %v761_v19 = vadd.f32 %v733_v17, %v271_v15  ;;  %v1114_v20 = vpop.f32.mrb[4].mxu1  ;;  %v1075_v21 = vpop.f32.mrb[5].mxu0 }
 0x135   : > { %v1076_v22 = vadd.f32 %v1075_v21, %v1074_v18  ;;  %v1115_v23 = vpop.f32.mrb[5].mxu1  ;;  %v1077_v24 = vpop.f32.mrb[6].mxu0 }
 0x136   : > { %769 = vst [vmem:[#allocation2 + $0x8] sm:$0xff] %v761_v19  ;;  %v1116_v25 = vadd.f32 %v1115_v23, %v1114_v20  ;;  %v1117_v26 = vpop.f32.mrb[6].mxu1  ;;  %v1078_v27 = vpop.f32.mrb[7].mxu0 }
 0x137   : > { %v1079_v29 = vadd.f32 %v1078_v27, %v1077_v24  ;;  %v1118_v30 = vpop.f32.mrb[7].mxu1 }
 0x138   : > { %v738_v31 = vadd.f32 %v1116_v25, %v1076_v22  ;;  %v1119_v32 = vadd.f32 %v1118_v30, %v1117_v26 }
 0x13a   : > { %v762_v34 = vadd.f32 %v738_v31, %v272_v28  ;;  %v741_v35 = vadd.f32 %v1119_v32, %v1079_v29 }
 0x13b   : > { %v1080_v36 = vpop.f32.mrb[8].mxu0  ;;  %v780_v9 = vld [vmem:[#allocation2] sm:$0xff] (!%p1048_p13) }
 0x13c   : > { %770 = vst [vmem:[#allocation2 + $0x10] sm:$0xff] %v762_v34  ;;  %v763_v37 = vadd.f32 %v741_v35, %v273_v33  ;;  %v1120_v38 = vpop.f32.mrb[8].mxu1  ;;  %v1081_v39 = vpop.f32.mrb[9].mxu0 }
 0x13d   : > { %v1082_v40 = vadd.f32 %v1081_v39, %v1080_v36  ;;  %v1121_v41 = vpop.f32.mrb[9].mxu1  ;;  %v1083_v42 = vpop.f32.mrb[10].mxu0  ;;  %v781_v10 = vld [vmem:[#allocation2 + $0x8] sm:$0xff] (!%p1048_p13) }
 0x13e   : > { %771 = vst [vmem:[#allocation2 + $0x18] sm:$0xff] %v763_v37  ;;  %v1122_v43 = vadd.f32 %v1121_v41, %v1120_v38  ;;  %v1123_v44 = vpop.f32.mrb[10].mxu1  ;;  %v1084_v45 = vpop.f32.mrb[11].mxu0  ;;  %v788_v12 = vadd.f32 (!%p1048_p13), %v781_v10, %v780_v9 }
 0x13f   : > { %v1085_v47 = vadd.f32 %v1084_v45, %v1083_v42  ;;  %v1124_v48 = vpop.f32.mrb[11].mxu1 }
 0x140   : > { %v746_v49 = vadd.f32 %v1122_v43, %v1082_v40  ;;  %v1125_v50 = vadd.f32 %v1124_v48, %v1123_v44 }
 0x142   : > { %v764_v52 = vadd.f32 %v746_v49, %v274_v46  ;;  %v749_v53 = vadd.f32 %v1125_v50, %v1085_v47 }
 0x143   : > { %v1086_v54 = vpop.f32.mrb[12].mxu0  ;;  %v782_v11 = vld [vmem:[#allocation2 + $0x10] sm:$0xff] (!%p1048_p13) }
 0x144   : > { %772 = vst [vmem:[#allocation2 + $0x20] sm:$0xff] %v764_v52  ;;  %v765_v55 = vadd.f32 %v749_v53, %v275_v51  ;;  %v1126_v56 = vpop.f32.mrb[12].mxu1  ;;  %v1087_v57 = vpop.f32.mrb[13].mxu0  ;;  %v789_v14 = vadd.f32 (!%p1048_p13), %v788_v12, %v782_v11 }
 0x145   : > { %v1088_v58 = vadd.f32 %v1087_v57, %v1086_v54  ;;  %v1127_v59 = vpop.f32.mrb[13].mxu1  ;;  %v1089_v60 = vpop.f32.mrb[14].mxu0  ;;  %v783_v13 = vld [vmem:[#allocation2 + $0x18] sm:$0xff] (!%p1048_p13) }
 0x146   : > { %773 = vst [vmem:[#allocation2 + $0x28] sm:$0xff] %v765_v55  ;;  %v1128_v61 = vadd.f32 %v1127_v59, %v1126_v56  ;;  %v1129_v62 = vpop.f32.mrb[14].mxu1  ;;  %v1090_v63 = vpop.f32.mrb[15].mxu0  ;;  %v790_v16 = vadd.f32 (!%p1048_p13), %v789_v14, %v783_v13 }
 0x147   : > { %v1091_v1 = vadd.f32 %v1090_v63, %v1089_v60  ;;  %v1130_v2 = vpop.f32.mrb[15].mxu1 }
 0x148   : > { %v754_v3 = vadd.f32 %v1128_v61, %v1088_v58  ;;  %v1131_v4 = vadd.f32 %v1130_v2, %v1129_v62  ;;  %779 = sbr.rel (%p1048_p13) target bundleno = 414 (0x19e), region = 59 }
 0x14a   : > { %v766_v6 = vadd.f32 %v754_v3, %v276_v0  ;;  %v757_v7 = vadd.f32 %v1131_v4, %v1091_v1 }
 0x14b   : > { %v784_v15 = vld [vmem:[#allocation2 + $0x20] sm:$0xff] (!%p1048_p13) }
 0x14c   : > { %774 = vst [vmem:[#allocation2 + $0x30] sm:$0xff] %v766_v6  ;;  %v767_v8 = vadd.f32 %v757_v7, %v277_v5  ;;  %v791_v18 = vadd.f32 (!%p1048_p13), %v790_v16, %v784_v15 }
 0x14d   : > { %v785_v17 = vld [vmem:[#allocation2 + $0x28] sm:$0xff] (!%p1048_p13) }
 0x14e   : > { %775 = vst [vmem:[#allocation2 + $0x38] sm:$0xff] %v767_v8  ;;  %v792_v20 = vadd.f32 (!%p1048_p13), %v791_v18, %v785_v17 }
 0x153   : > { %v786_v19 = vld [vmem:[#allocation2 + $0x30] sm:$0xff] }
 0x154   : > { %v793_v22 = vadd.f32 %v792_v20, %v786_v19 }
 0x155   : > { %v787_v21 = vld [vmem:[#allocation2 + $0x38] sm:$0xff] }
 0x156   : > { %v794_v23 = vadd.f32 %v793_v22, %v787_v21 }
 0x158   : > { %v795_v24 = vrot.slane %v794_v23, 4 }
 0x15a   : > { %v796_v25 = vadd.f32 %v795_v24, %v794_v23 }
 0x15c   : > { %v797_v26 = vrot.slane %v796_v25, 2 }
 0x15e   : > { %v798_v27 = vadd.f32 %v797_v26, %v796_v25 }
 0x160   : > { %v799_v28 = vrot.slane %v798_v27, 1 }
 0x162   : > { %v800_v29 = vadd.f32 %v799_v28, %v798_v27 }
 0x164   : > { %v802_v30 = vmul.f32 0.015625, %v800_v29 }
 0x166   : > { %v803_v31 = vsub.f32 %v780_v9, %v802_v30  ;;  %v804_v32 = vsub.f32 %v781_v10, %v802_v30  ;;  %v805_v33 = vsub.f32 %v782_v11, %v802_v30  ;;  %v806_v34 = vsub.f32 %v783_v13, %v802_v30 }
 0x167   : > { %v807_v35 = vsub.f32 %v784_v15, %v802_v30  ;;  %v808_v39 = vsub.f32 %v785_v17, %v802_v30  ;;  %v809_v42 = vsub.f32 %v786_v19, %v802_v30  ;;  %v810_v45 = vsub.f32 %v787_v21, %v802_v30 }
 0x168   : > { %v811_v36 = vmul.f32 %v803_v31, %v803_v31  ;;  %v812_v37 = vmul.f32 %v804_v32, %v804_v32  ;;  %v813_v38 = vmul.f32 %v805_v33, %v805_v33  ;;  %v814_v40 = vmul.f32 %v806_v34, %v806_v34 }
 0x169   : > { %v815_v43 = vmul.f32 %v807_v35, %v807_v35  ;;  %v816_v46 = vmul.f32 %v808_v39, %v808_v39  ;;  %v817_v48 = vmul.f32 %v809_v42, %v809_v42  ;;  %v818_v50 = vmul.f32 %v810_v45, %v810_v45 }
 0x16a   : > { %v819_v41 = vadd.f32 %v812_v37, %v811_v36 }
 0x16c   : > { %v820_v44 = vadd.f32 %v819_v41, %v813_v38 }
 0x16e   : > { %v821_v47 = vadd.f32 %v820_v44, %v814_v40 }
 0x170   : > { %v822_v49 = vadd.f32 %v821_v47, %v815_v43 }
 0x172   : > { %v823_v51 = vadd.f32 %v822_v49, %v816_v46 }
 0x174   : > { %v824_v52 = vadd.f32 %v823_v51, %v817_v48 }
 0x176   : > { %v825_v53 = vadd.f32 %v824_v52, %v818_v50 }
 0x178   : > { %v826_v54 = vrot.slane %v825_v53, 4 }
 0x17a   : > { %v827_v55 = vadd.f32 %v826_v54, %v825_v53 }
 0x17c   : > { %v828_v56 = vrot.slane %v827_v55, 2 }
 0x17e   : > { %v829_v57 = vadd.f32 %v828_v56, %v827_v55 }
 0x180   : > { %v830_v58 = vrot.slane %v829_v57, 1 }
 0x182   : > { %v831_v59 = vadd.f32 %v830_v58, %v829_v57 }
 0x184   : > { %v832_v60 = vmul.f32 0.015625, %v831_v59 }
 0x186   : > { %v833_v61 = vadd.f32 1e-05, %v832_v60 }
 0x188   : > { %1245 = vrsqrt.f32 %v833_v61 }
 0x192   : > { %v1246_v62 = vpop.eup %1245 }
 0x193   : > { %v835_v63 = vmul.f32 %v1246_v62, %v803_v31  ;;  %v836_v0 = vmul.f32 %v1246_v62, %v804_v32  ;;  %v837_v1 = vmul.f32 %v1246_v62, %v805_v33  ;;  %v838_v2 = vmul.f32 %v1246_v62, %v806_v34 }
 0x194   : > { %v839_v3 = vmul.f32 %v1246_v62, %v807_v35  ;;  %v840_v4 = vmul.f32 %v1246_v62, %v808_v39  ;;  %v841_v5 = vmul.f32 %v1246_v62, %v809_v42  ;;  %v842_v6 = vmul.f32 %v1246_v62, %v810_v45 }
 0x195   : > { %vm843_vm0 = vcmp.gt.f32.partialorder %v835_v63, 0.0  ;;  %v851_v7 = vmul.f32 0.2, %v835_v63  ;;  %vm844_vm1 = vcmp.gt.f32.partialorder %v836_v0, 0.0  ;;  %v852_v8 = vmul.f32 0.2, %v836_v0 }
 0x196   : > { %vm845_vm2 = vcmp.gt.f32.partialorder %v837_v1, 0.0  ;;  %v853_v9 = vmul.f32 0.2, %v837_v1  ;;  %vm846_vm3 = vcmp.gt.f32.partialorder %v838_v2, 0.0  ;;  %v854_v10 = vmul.f32 0.2, %v838_v2 }
 0x197   : > { %v859_v11 = vsel %vm843_vm0, %v835_v63, %v851_v7  ;;  %v860_v12 = vsel %vm844_vm1, %v836_v0, %v852_v8  ;;  %vm847_vm4 = vcmp.gt.f32.partialorder %v839_v3, 0.0  ;;  %v855_v13 = vmul.f32 0.2, %v839_v3 }
 0x198   : > { %867 = vst [vmem:[%s1411_s25] sm:$0xff] %v859_v11  ;;  %868 = vst [vmem:[%s1411_s25 + $0x8] sm:$0xff] %v860_v12  ;;  %v861_v14 = vsel %vm845_vm2, %v837_v1, %v853_v9  ;;  %v862_v15 = vsel %vm846_vm3, %v838_v2, %v854_v10  ;;  %vm848_vm5 = vcmp.gt.f32.partialorder %v840_v4, 0.0  ;;  %v856_v16 = vmul.f32 0.2, %v840_v4 }
 0x199   : > { %869 = vst [vmem:[%s1411_s25 + $0x10] sm:$0xff] %v861_v14  ;;  %870 = vst [vmem:[%s1411_s25 + $0x18] sm:$0xff] %v862_v15  ;;  %v863_v17 = vsel %vm847_vm4, %v839_v3, %v855_v13  ;;  %vm849_vm6 = vcmp.gt.f32.partialorder %v841_v5, 0.0  ;;  %v857_v18 = vmul.f32 0.2, %v841_v5  ;;  %vm850_vm7 = vcmp.gt.f32.partialorder %v842_v6, 0.0 }
 0x19a   : > { %871 = vst [vmem:[%s1411_s25 + $0x20] sm:$0xff] %v863_v17  ;;  %v864_v19 = vsel %vm848_vm5, %v840_v4, %v856_v16  ;;  %v858_v20 = vmul.f32 0.2, %v842_v6 }
 0x19b   : > { %872 = vst [vmem:[%s1411_s25 + $0x28] sm:$0xff] %v864_v19  ;;  %v865_v21 = vsel %vm849_vm6, %v841_v5, %v857_v18 }
 0x19c   : > { %873 = vst [vmem:[%s1411_s25 + $0x30] sm:$0xff] %v865_v21  ;;  %v866_v22 = vsel %vm850_vm7, %v842_v6, %v858_v20 }
 0x19d   : > { %874 = vst [vmem:[%s1411_s25 + $0x38] sm:$0xff] %v866_v22 }
 0x19e PF: > { %s12_s15 = sadd.s32 1, %s1301_s15   ;;  %s1497_s9 = smov %s1281_s10 }
 0x19f   : > { %p9_p0 = scmp.ge.s32.totalorder %s12_s15, 6   ;;  %s1498_s10 = smov %s1370_s22 }
 0x1a0   : > { %s1499_s11 = smov %s1293_s13  ;;  %s1500_s12 = smov %s1297_s14 }
 0x1a1   : > { %s1501_s13 = smov %s1504_s16  ;;  %s1502_s14 = smov %s1508_s17 }
 0x1a2   :  { %11 = sbr.rel (!%p9_p0) target bundleno = 4 (0x4), region = 97 }

// kernel: discriminator_forward.7
= control target key start
LH: loop header
LB: loop body
LE: loop exit
PB: predicated region body
PF: predicated region fallthrough
CT: control target
= control target key end

     0   :  { %s1269_s9 = smov 0   ;;  %s1271_s10 = smov 0   ;;  %s1442_s0 = inlined_call_operand.vmem [shape: bf16[2,16,2048], index: 0, kind: input, shape index: {}]   ;;  %s1443_s1 = inlined_call_operand.vmem [shape: bf16[2048,256], index: 1, kind: input, shape index: {}]   ;;  %s1444_s2 = inlined_call_operand.vmem [shape: f32[2,16,256], index: 2, kind: output, shape index: {}]  }
   0x1   :  { %s1273_s11 = smov 0   ;;  %s1275_s12 = smov 0  }
   0x2   :  { %s1277_s13 = smov 0   ;;  %s1279_s14 = smov 0  }
   0x3   :  { %s1281_s15 = smov 0  }
   0x4 LB: > { %s24_s16 = sadd.s32 1, %s1243_s13  ;;  %s31_s17 = sadd.s32 1, %s1247_s14  ;;  %s1251_s15 = sphi %s1281_s15, %s12_s15   ;;  %s1247_s14 = sphi %s1279_s14, %s1450_s14   ;;  %s1243_s13 = sphi %s1277_s13, %s1449_s13   ;;  %s1239_s12 = sphi %s1275_s12, %s1448_s12   ;;  %s1235_s11 = sphi %s1273_s11, %s1447_s11   ;;  %s1231_s10 = sphi %s1271_s10, %s1446_s10   ;;  %s1227_s9 = sphi %s1269_s9, %s1445_s9  }
   0x5   : > { %p25_p0 = scmp.ge.s32.totalorder %s24_s16, 4  ;;  %p49_p1 = scmp.ne.s32.totalorder %s1231_s10, %s1227_s9 }
   0x6   : > { %p50_p2 = scmp.eq.s32.totalorder %s1251_s15, 0  ;;  %s42_s21 = sadd.s32 1, %s1231_s10 }
   0x7   : > { %s1452_s16 = smov (%p25_p0, %s24_s16), 0  ;;  %s1454_s17 = smov (!%p25_p0, %s31_s17), %s1247_s14 }
   0x8   : > { %p51_p3 = por %p50_p2, %p49_p1  ;;  %p33_p4 = scmp.ge.s32.totalorder %s1454_s17, 2 }
   0x9   : > { %s38_s18 = ssub.s32 %s1243_s13, %s1452_s16  ;;  %p944_p6 = scmp.ge.s32.totalorder %s1251_s15, 8 }
   0xa   : > { %s1456_s17 = smov (%p33_p4, %s1454_s17), 0 }
   0xb   : > { %s35_s19 = ssub.s32 %s1247_s14, %s1456_s17  ;;  %129 = sbr.rel (%p944_p6) target bundleno = 27 (0x1b), region = 16 }
   0xc   : > { %s39_s20 = sor.u32 %s38_s18, %s35_s19 }
   0xd   : > { %p40_p5 = scmp.eq.s32.totalorder %s39_s20, 0 }
   0xf   : > { %s1320_s22 = scalar_select %p40_p5, %s1231_s10, %s42_s21  }
  0x12   : > { %132 = sbr.rel (!%p51_p3) target bundleno = 27 (0x1b), region = 20  ;;  %s134_s23 = sand.u32 (%p51_p3), 1, %s1231_s10  }
  0x13   : > { %s946_s24 = sshll.u32 (%p51_p3), %s1243_s13, 2  ;;  %s945_s25 = sshll.u32 (%p51_p3), %s134_s23, 5 }
  0x14   : > { %s947_s26 = sshll.u32 (%p51_p3), %s1247_s14, 5  ;;  %s136_s4 = scalar_lea.vmem (%p51_p3), [#allocation3], %s945_s25 }
  0x15   : > { %s142_s27 = sadd.s32 (%p51_p3), %s947_s26, %s946_s24 }
  0x16   : > { %s948_s28 = sshll.u32 (%p51_p3), %s142_s27, 2 }
  0x17   : > { %s144_s3 = scalar_lea.vmem (%p51_p3), %s1442_s0, %s948_s28 }
  0x18   : > { %v157_v0 = vld [vmem:[%s144_s3] sm:$0xff] (%p51_p3)  ;;  %v159_v1 = vld [vmem:[%s144_s3 + $0x8] sm:$0xff] (%p51_p3) }
  0x19   : > { %v161_v2 = vld [vmem:[%s144_s3 + $0x40] sm:$0xff]  ;;  %158 = vst [vmem:[%s136_s4] sm:$0xff] %v157_v0  ;;  %160 = vst [vmem:[%s136_s4 + $0x8] sm:$0xff] %v159_v1  ;;  %v163_v3 = vld [vmem:[%s144_s3 + $0x48] sm:$0xff] }
  0x1a   : > { %162 = vst [vmem:[%s136_s4 + $0x10] sm:$0xff] %v161_v2  ;;  %164 = vst [vmem:[%s136_s4 + $0x18] sm:$0xff] %v163_v3 }
  0x1b PF: > { %p949_p7 = scmp.ge.s32.totalorder %s1251_s15, 1  ;;  %p179_p8 = scmp.lt.s32.totalorder %s1251_s15, 9 }
  0x1d   : > { %p180_p9 = pnand %p949_p7, %p179_p8 }
  0x1e   : > { %s186_s5 = sand.u32 (!%p180_p9), 1, %s1227_s9   ;;  %s951_s6 = sshll.u32 (!%p180_p9), %s1235_s11, 6 }
  0x1f   : > { %183 = sbr.rel (%p180_p9) target bundleno = 396 (0x18c), region = 47  ;;  %s950_s7 = sshll.u32 (!%p180_p9), %s186_s5, 5 }
  0x20   : > { %p221_p10 = scmp.lt.s32.totalorder (!%p180_p9), %s951_s6, 255  ;;  %p228_p11 = scmp.lt.s32.totalorder (!%p180_p9), %s1239_s12, 1 }
  0x21   : > { %s1345_s26 = scalar_lea.vmem (!%p180_p9), [#allocation3], %s950_s7  ;;  %p956_p12 = scmp.ne.s32.totalorder (!%p180_p9), %s1235_s11, 0 }
  0x26   : > { %s1458_s6 = smov (!%p221_p10, %s951_s6), 255  ;;  %s1460_s12 = smov (!%p228_p11, %s1239_s12), 1 }
  0x27   : > { %s1028_s8 = sshll.u32 %s1458_s6, 3  ;;  %s1029_s21 = sshll.u32 %s1460_s12, 5  ;;  %v1253_v4 = vmov (!%p956_p12), 0.0  }
  0x28   : > { %s1338_s20 = scalar_lea.vmem %s1443_s1, %s1028_s8  ;;  %s1343_s25 = scalar_lea.vmem %s1444_s2, %s1029_s21  ;;  %242 = vst [vmem:[#allocation2] sm:$0xff] (!%p956_p12), %v1253_v4  ;;  %243 = vst [vmem:[#allocation2 + $0x8] sm:$0xff] (!%p956_p12), %v1253_v4 }
  0x29   : > { %241 = sbr.rel (%p956_p12) target bundleno = 48 (0x30), region = 55  ;;  %244 = vst [vmem:[#allocation2 + $0x10] sm:$0xff] (!%p956_p12), %v1253_v4  ;;  %245 = vst [vmem:[#allocation2 + $0x18] sm:$0xff] (!%p956_p12), %v1253_v4 }
  0x30 PF: > { %v1091_v5 = vld [vmem:[%s1338_s20 + $0x4] ss:$8 sps:$4 sm:$0xff]   ;;  %v1095_v7 = vld [vmem:[%s1338_s20] ss:$8 sps:$4 sm:$0xff]   ;;  %v1097_v9 = vld [vmem:[%s1338_s20 + $0x14] ss:$8 sps:$4 sm:$0xff]  }
  0x31   : > { %v1093_v6 = vld [vmem:[%s1338_s20 + $0x104] ss:$8 sps:$4 sm:$0xff]   ;;  %658 = vmatprep.subr.bf16.mxu1 %v1091_v5  ;;  %v1096_v8 = vld [vmem:[%s1338_s20 + $0x100] ss:$8 sps:$4 sm:$0xff]   ;;  %v1099_v10 = vld [vmem:[%s1338_s20 + $0x114] ss:$8 sps:$4 sm:$0xff]  }
  0x32   : > { %701 = vmatprep.subr.bf16.mxu0 %v1093_v6  ;;  %659 = vmatpush1.bf16.msra.mxu1 %v1095_v7  ;;  %v1101_v11 = vld [vmem:[%s1338_s20 + $0x10] ss:$8 sps:$4 sm:$0xff]   ;;  %v1103_v13 = vld [vmem:[%s1338_s20 + $0x24] ss:$8 sps:$4 sm:$0xff]   ;;  %v1107_v15 = vld [vmem:[%s1338_s20 + $0x20] ss:$8 sps:$4 sm:$0xff]  }
  0x33   : > { %702 = vmatpush1.bf16.msra.mxu0 %v1096_v8  ;;  %660 = vmatprep.subr.bf16.mxu1 %v1097_v9  ;;  %v1102_v12 = vld [vmem:[%s1338_s20 + $0x110] ss:$8 sps:$4 sm:$0xff]   ;;  %v1105_v14 = vld [vmem:[%s1338_s20 + $0x124] ss:$8 sps:$4 sm:$0xff]   ;;  %v1108_v16 = vld [vmem:[%s1338_s20 + $0x120] ss:$8 sps:$4 sm:$0xff]  }
  0x34   : > { %703 = vmatprep.subr.bf16.mxu0 %v1099_v10  ;;  %v1109_v17 = vld [vmem:[%s1338_s20 + $0x34] ss:$8 sps:$4 sm:$0xff]   ;;  %v1113_v19 = vld [vmem:[%s1338_s20 + $0x30] ss:$8 sps:$4 sm:$0xff]   ;;  %v1115_v21 = vld [vmem:[%s1338_s20 + $0x44] ss:$8 sps:$4 sm:$0xff]  }
  0x35   : > { %v1111_v18 = vld [vmem:[%s1338_s20 + $0x134] ss:$8 sps:$4 sm:$0xff]   ;;  %v1114_v20 = vld [vmem:[%s1338_s20 + $0x130] ss:$8 sps:$4 sm:$0xff]   ;;  %v1117_v22 = vld [vmem:[%s1338_s20 + $0x144] ss:$8 sps:$4 sm:$0xff]  }
  0x36   : > { %661 = vmatpush1.bf16.msra.mxu1 %v1101_v11  ;;  %v1119_v23 = vld [vmem:[%s1338_s20 + $0x40] ss:$8 sps:$4 sm:$0xff]   ;;  %v1121_v25 = vld [vmem:[%s1338_s20 + $0x54] ss:$8 sps:$4 sm:$0xff]   ;;  %v1125_v27 = vld [vmem:[%s1338_s20 + $0x50] ss:$8 sps:$4 sm:$0xff]  }
  0x37   : > { %704 = vmatpush1.bf16.msra.mxu0 %v1102_v12  ;;  %662 = vmatprep.subr.bf16.mxu1 %v1103_v13  ;;  %v1120_v24 = vld [vmem:[%s1338_s20 + $0x140] ss:$8 sps:$4 sm:$0xff]   ;;  %v1123_v26 = vld [vmem:[%s1338_s20 + $0x154] ss:$8 sps:$4 sm:$0xff]   ;;  %v1126_v28 = vld [vmem:[%s1338_s20 + $0x150] ss:$8 sps:$4 sm:$0xff]  }
  0x38   : > { %705 = vmatprep.subr.bf16.mxu0 %v1105_v14  ;;  %v1127_v29 = vld [vmem:[%s1338_s20 + $0x64] ss:$8 sps:$4 sm:$0xff]   ;;  %v1131_v31 = vld [vmem:[%s1338_s20 + $0x60] ss:$8 sps:$4 sm:$0xff]   ;;  %v1133_v33 = vld [vmem:[%s1338_s20 + $0x74] ss:$8 sps:$4 sm:$0xff]  }
  0x39   : > { %v1129_v30 = vld [vmem:[%s1338_s20 + $0x164] ss:$8 sps:$4 sm:$0xff]   ;;  %v1132_v32 = vld [vmem:[%s1338_s20 + $0x160] ss:$8 sps:$4 sm:$0xff]   ;;  %v1135_v34 = vld [vmem:[%s1338_s20 + $0x174] ss:$8 sps:$4 sm:$0xff]  }
  0x3a   : > { %663 = vmatpush1.bf16.msra.mxu1 %v1107_v15  ;;  %v1137_v35 = vld [vmem:[%s1338_s20 + $0x70] ss:$8 sps:$4 sm:$0xff]   ;;  %v1139_v37 = vld [vmem:[%s1338_s20 + $0x84] ss:$8 sps:$4 sm:$0xff]   ;;  %v1143_v39 = vld [vmem:[%s1338_s20 + $0x80] ss:$8 sps:$4 sm:$0xff]  }
  0x3b   : > { %706 = vmatpush1.bf16.msra.mxu0 %v1108_v16  ;;  %664 = vmatprep.subr.bf16.mxu1 %v1109_v17  ;;  %v1138_v36 = vld [vmem:[%s1338_s20 + $0x170] ss:$8 sps:$4 sm:$0xff]   ;;  %v1141_v38 = vld [vmem:[%s1338_s20 + $0x184] ss:$8 sps:$4 sm:$0xff]   ;;  %v1144_v40 = vld [vmem:[%s1338_s20 + $0x180] ss:$8 sps:$4 sm:$0xff]  }
  0x3c   : > { %707 = vmatprep.subr.bf16.mxu0 %v1111_v18  ;;  %v1145_v41 = vld [vmem:[%s1338_s20 + $0x94] ss:$8 sps:$4 sm:$0xff]   ;;  %v1149_v43 = vld [vmem:[%s1338_s20 + $0x90] ss:$8 sps:$4 sm:$0xff]   ;;  %v1151_v45 = vld [vmem:[%s1338_s20 + $0xa4] ss:$8 sps:$4 sm:$0xff]  }
  0x3d   : > { %v1147_v42 = vld [vmem:[%s1338_s20 + $0x194] ss:$8 sps:$4 sm:$0xff]   ;;  %v1150_v44 = vld [vmem:[%s1338_s20 + $0x190] ss:$8 sps:$4 sm:$0xff]   ;;  %v1153_v46 = vld [vmem:[%s1338_s20 + $0x1a4] ss:$8 sps:$4 sm:$0xff]  }
  0x3e   : > { %665 = vmatpush1.bf16.msra.mxu1 %v1113_v19  ;;  %v1155_v47 = vld [vmem:[%s1338_s20 + $0xa0] ss:$8 sps:$4 sm:$0xff]   ;;  %v1157_v49 = vld [vmem:[%s1338_s20 + $0xb4] ss:$8 sps:$4 sm:$0xff]   ;;  %v1161_v51 = vld [vmem:[%s1338_s20 + $0xb0] ss:$8 sps:$4 sm:$0xff]  }
  0x3f   : > { %708 = vmatpush1.bf16.msra.mxu0 %v1114_v20  ;;  %666 = vmatprep.subr.bf16.mxu1 %v1115_v21  ;;  %v1156_v48 = vld [vmem:[%s1338_s20 + $0x1a0] ss:$8 sps:$4 sm:$0xff]   ;;  %v1159_v50 = vld [vmem:[%s1338_s20 + $0x1b4] ss:$8 sps:$4 sm:$0xff]   ;;  %v1162_v53 = vld [vmem:[%s1338_s20 + $0x1b0] ss:$8 sps:$4 sm:$0xff]  }
  0x40   : > { %709 = vmatprep.subr.bf16.mxu0 %v1117_v22  ;;  %v1189_v52 = vld [vmem:[%s1345_s26 + $0x4] ss:$16 sps:$4 sm:$0xff]   ;;  %v1192_v56 = vld [vmem:[%s1345_s26 + $0xc] ss:$16 sps:$4 sm:$0xff]   ;;  %v1167_v57 = vld [vmem:[%s1338_s20 + $0xc0] ss:$8 sps:$4 sm:$0xff]  }
  0x41   : > { %v1163_v54 = vld [vmem:[%s1338_s20 + $0xc4] ss:$8 sps:$4 sm:$0xff]   ;;  %690 = vmatprep.mubr.bf16.mxu1 %v1189_v52  ;;  %733 = vmatprep.mubr.bf16.mxu0 %v1192_v56  ;;  %v1168_v58 = vld [vmem:[%s1338_s20 + $0x1c0] ss:$8 sps:$4 sm:$0xff]   ;;  %v1169_v59 = vld [vmem:[%s1338_s20 + $0xd4] ss:$8 sps:$4 sm:$0xff]  }
  0x42   : > { %667 = vmatpush1.bf16.msra.mxu1 %v1119_v23  ;;  %v1165_v55 = vld [vmem:[%s1338_s20 + $0x1c4] ss:$8 sps:$4 sm:$0xff]   ;;  %v1171_v60 = vld [vmem:[%s1338_s20 + $0x1d4] ss:$8 sps:$4 sm:$0xff]   ;;  %v1173_v61 = vld [vmem:[%s1338_s20 + $0xd0] ss:$8 sps:$4 sm:$0xff]  }
  0x43   : > { %710 = vmatpush1.bf16.msra.mxu0 %v1120_v24  ;;  %668 = vmatprep.subr.bf16.mxu1 %v1121_v25  ;;  %v1174_v62 = vld [vmem:[%s1338_s20 + $0x1d0] ss:$8 sps:$4 sm:$0xff]   ;;  %v1175_v63 = vld [vmem:[%s1338_s20 + $0xe4] ss:$8 sps:$4 sm:$0xff]   ;;  %v1179_v1 = vld [vmem:[%s1338_s20 + $0xe0] ss:$8 sps:$4 sm:$0xff]  }
  0x44   : > { %711 = vmatprep.subr.bf16.mxu0 %v1123_v26  ;;  %v1177_v0 = vld [vmem:[%s1338_s20 + $0x1e4] ss:$8 sps:$4 sm:$0xff]   ;;  %v1180_v2 = vld [vmem:[%s1338_s20 + $0x1e0] ss:$8 sps:$4 sm:$0xff]   ;;  %v1181_v3 = vld [vmem:[%s1338_s20 + $0xf4] ss:$8 sps:$4 sm:$0xff]  }
  0x45   : > { %v1183_v4 = vld [vmem:[%s1338_s20 + $0x1f4] ss:$8 sps:$4 sm:$0xff]   ;;  %v1185_v5 = vld [vmem:[%s1338_s20 + $0xf0] ss:$8 sps:$4 sm:$0xff]   ;;  %v246_v10 = vld [vmem:[#allocation2] sm:$0xff]  ;;  %p1025_p13 = scmp.ne.s32.totalorder %s1235_s11, 3 }
  0x46   : > { %669 = vmatpush1.bf16.msra.mxu1 %v1125_v27  ;;  %v1186_v6 = vld [vmem:[%s1338_s20 + $0x1f0] ss:$8 sps:$4 sm:$0xff]   ;;  %v247_v14 = vld [vmem:[#allocation2 + $0x8] sm:$0xff] }
  0x47   : > { %712 = vmatpush1.bf16.msra.mxu0 %v1126_v28  ;;  %670 = vmatprep.subr.bf16.mxu1 %v1127_v29  ;;  %v1187_v7 = vld [vmem:[%s1345_s26] ss:$16 sps:$4 sm:$0xff]   ;;  %v1190_v8 = vld [vmem:[%s1345_s26 + $0x8] ss:$16 sps:$4 sm:$0xff]  }
  0x48   : > { %713 = vmatprep.subr.bf16.mxu0 %v1129_v30  ;;  %v248_v18 = vld [vmem:[#allocation2 + $0x10] sm:$0xff]  ;;  %v249_v23 = vld [vmem:[#allocation2 + $0x18] sm:$0xff] }
  0x4a   : > { %671 = vmatpush1.bf16.msra.mxu1 %v1131_v31 }
  0x4b   : > { %714 = vmatpush1.bf16.msra.mxu0 %v1132_v32  ;;  %672 = vmatprep.subr.bf16.mxu1 %v1133_v33 }
  0x4c   : > { %715 = vmatprep.subr.bf16.mxu0 %v1135_v34 }
  0x4e   : > { %673 = vmatpush1.bf16.msra.mxu1 %v1137_v35 }
  0x4f   : > { %716 = vmatpush1.bf16.msra.mxu0 %v1138_v36  ;;  %674 = vmatprep.subr.bf16.mxu1 %v1139_v37 }
  0x50   : > { %717 = vmatprep.subr.bf16.mxu0 %v1141_v38 }
  0x52   : > { %675 = vmatpush1.bf16.msra.mxu1 %v1143_v39 }
  0x53   : > { %718 = vmatpush1.bf16.msra.mxu0 %v1144_v40  ;;  %676 = vmatprep.subr.bf16.mxu1 %v1145_v41 }
  0x54   : > { %719 = vmatprep.subr.bf16.mxu0 %v1147_v42 }
  0x56   : > { %677 = vmatpush1.bf16.msra.mxu1 %v1149_v43 }
  0x57   : > { %720 = vmatpush1.bf16.msra.mxu0 %v1150_v44  ;;  %678 = vmatprep.subr.bf16.mxu1 %v1151_v45 }
  0x58   : > { %721 = vmatprep.subr.bf16.mxu0 %v1153_v46 }
  0x5a   : > { %679 = vmatpush1.bf16.msra.mxu1 %v1155_v47 }
  0x5b   : > { %722 = vmatpush1.bf16.msra.mxu0 %v1156_v48  ;;  %680 = vmatprep.subr.bf16.mxu1 %v1157_v49 }
  0x5c   : > { %723 = vmatprep.subr.bf16.mxu0 %v1159_v50 }
  0x5e   : > { %681 = vmatpush1.bf16.msra.mxu1 %v1161_v51 }
  0x5f   : > { %724 = vmatpush1.bf16.msra.mxu0 %v1162_v53  ;;  %682 = vmatprep.subr.bf16.mxu1 %v1163_v54 }
  0x60   : > { %725 = vmatprep.subr.bf16.mxu0 %v1165_v55 }
  0x62   : > { %683 = vmatpush1.bf16.msra.mxu1 %v1167_v57 }
  0x63   : > { %726 = vmatpush1.bf16.msra.mxu0 %v1168_v58  ;;  %684 = vmatprep.subr.bf16.mxu1 %v1169_v59 }
  0x64   : > { %727 = vmatprep.subr.bf16.mxu0 %v1171_v60 }
  0x66   : > { %685 = vmatpush1.bf16.msra.mxu1 %v1173_v61 }
  0x67   : > { %728 = vmatpush1.bf16.msra.mxu0 %v1174_v62  ;;  %686 = vmatprep.subr.bf16.mxu1 %v1175_v63 }
  0x68   : > { %729 = vmatprep.subr.bf16.mxu0 %v1177_v0 }
  0x6a   : > { %687 = vmatpush1.bf16.msra.mxu1 %v1179_v1 }
  0x6b   : > { %730 = vmatpush1.bf16.msra.mxu0 %v1180_v2  ;;  %688 = vmatprep.subr.bf16.mxu1 %v1181_v3 }
  0x6c   : > { %731 = vmatprep.subr.bf16.mxu0 %v1183_v4 }
  0x6e   : > { %689 = vmatpush1.bf16.msra.mxu1 %v1185_v5 }
  0x6f   : > { %732 = vmatpush1.bf16.msra.mxu0 %v1186_v6 }
  0x71   : > { %691 = vmatmul.mubr.bf16.vlgmr.msra.gmra.mrb[0].mxu1 %v1187_v7 }
  0x72   : > { %734 = vmatmul.mubr.bf16.vlgmr.msra.gmra.mrb[0].mxu0 %v1190_v8 }
 0x144   : > { %v692_v9 = vpop.f32.mrb[0].mxu1 }
 0x145   : > { %v735_v11 = vpop.f32.mrb[0].mxu0  ;;  %v694_v13 = vpop.f32.mrb[1].mxu1 }
 0x146   : > { %v736_v12 = vadd.f32 %v735_v11, %v692_v9  ;;  %v737_v15 = vpop.f32.mrb[1].mxu0  ;;  %v696_v17 = vpop.f32.mrb[2].mxu1 }
 0x147   : > { %v738_v16 = vadd.f32 %v737_v15, %v694_v13  ;;  %v739_v19 = vpop.f32.mrb[2].mxu0  ;;  %v698_v22 = vpop.f32.mrb[3].mxu1  ;;  %755 = sbr.rel (%p1025_p13) target bundleno = 396 (0x18c), region = 59 }
 0x148   : > { %v744_v20 = vadd.f32 %v736_v12, %v246_v10  ;;  %v740_v21 = vadd.f32 %v739_v19, %v696_v17  ;;  %v741_v24 = vpop.f32.mrb[3].mxu0 }
 0x149   : > { %v745_v25 = vadd.f32 %v738_v16, %v247_v14  ;;  %v742_v26 = vadd.f32 %v741_v24, %v698_v22 }
 0x14a   : > { %748 = vst [vmem:[#allocation2] sm:$0xff] %v744_v20  ;;  %v746_v27 = vadd.f32 %v740_v21, %v248_v18 }
 0x14b   : > { %749 = vst [vmem:[#allocation2 + $0x8] sm:$0xff] %v745_v25  ;;  %v747_v28 = vadd.f32 %v742_v26, %v249_v23 }
 0x14c   : > { %750 = vst [vmem:[#allocation2 + $0x10] sm:$0xff] %v746_v27 }
 0x14d   : > { %751 = vst [vmem:[#allocation2 + $0x18] sm:$0xff] %v747_v28 }
 0x151   : > { %v756_v29 = vld [vmem:[#allocation2] sm:$0xff] }
 0x152   : > { %v757_v31 = vld [vmem:[#allocation2 + $0x8] sm:$0xff] }
 0x153   : > { %v758_v30 = vld [vmem:[#allocation2 + $0x10] sm:$0xff] }
 0x154   : > { %v760_v32 = vadd.f32 %v758_v30, %v756_v29  ;;  %v759_v33 = vld [vmem:[#allocation2 + $0x18] sm:$0xff] }
 0x155   : > { %v767_v34 = vadd.f32 %v759_v33, %v757_v31 }
 0x156   : > { %v761_v35 = vrot.slane %v760_v32, 4 }
 0x157   : > { %v768_v36 = vrot.slane %v767_v34, 4 }
 0x158   : > { %v762_v37 = vadd.f32 %v761_v35, %v760_v32 }
 0x159   : > { %v769_v38 = vadd.f32 %v768_v36, %v767_v34 }
 0x15a   : > { %v763_v39 = vrot.slane %v762_v37, 2 }
 0x15b   : > { %v770_v40 = vrot.slane %v769_v38, 2 }
 0x15c   : > { %v764_v41 = vadd.f32 %v763_v39, %v762_v37 }
 0x15d   : > { %v771_v42 = vadd.f32 %v770_v40, %v769_v38 }
 0x15e   : > { %v765_v43 = vrot.slane %v764_v41, 1 }
 0x15f   : > { %v772_v44 = vrot.slane %v771_v42, 1 }
 0x160   : > { %v766_v45 = vadd.f32 %v765_v43, %v764_v41 }
 0x161   : > { %v773_v46 = vadd.f32 %v772_v44, %v771_v42 }
 0x162   : > { %v775_v47 = vmul.f32 0.0625, %v766_v45 }
 0x163   : > { %v776_v48 = vmul.f32 0.0625, %v773_v46 }
 0x164   : > { %v777_v49 = vsub.f32 %v756_v29, %v775_v47  ;;  %v779_v50 = vsub.f32 %v758_v30, %v775_v47 }
 0x165   : > { %v778_v51 = vsub.f32 %v757_v31, %v776_v48  ;;  %v780_v52 = vsub.f32 %v759_v33, %v776_v48 }
 0x166   : > { %v781_v53 = vmul.f32 %v777_v49, %v777_v49  ;;  %v783_v54 = vmul.f32 %v779_v50, %v779_v50 }
 0x167   : > { %v782_v55 = vmul.f32 %v778_v51, %v778_v51  ;;  %v784_v56 = vmul.f32 %v780_v52, %v780_v52 }
 0x168   : > { %v785_v57 = vadd.f32 %v783_v54, %v781_v53 }
 0x169   : > { %v792_v58 = vadd.f32 %v784_v56, %v782_v55 }
 0x16a   : > { %v786_v59 = vrot.slane %v785_v57, 4 }
 0x16b   : > { %v793_v60 = vrot.slane %v792_v58, 4 }
 0x16c   : > { %v787_v61 = vadd.f32 %v786_v59, %v785_v57 }
 0x16d   : > { %v794_v62 = vadd.f32 %v793_v60, %v792_v58 }
 0x16e   : > { %v788_v63 = vrot.slane %v787_v61, 2 }
 0x16f   : > { %v795_v0 = vrot.slane %v794_v62, 2 }
 0x170   : > { %v789_v1 = vadd.f32 %v788_v63, %v787_v61 }
 0x171   : > { %v796_v2 = vadd.f32 %v795_v0, %v794_v62 }
 0x172   : > { %v790_v3 = vrot.slane %v789_v1, 1 }
 0x173   : > { %v797_v4 = vrot.slane %v796_v2, 1 }
 0x174   : > { %v791_v5 = vadd.f32 %v790_v3, %v789_v1 }
 0x175   : > { %v798_v6 = vadd.f32 %v797_v4, %v796_v2 }
 0x176   : > { %v799_v7 = vmul.f32 0.0625, %v791_v5 }
 0x177   : > { %v800_v8 = vmul.f32 0.0625, %v798_v6 }
 0x178   : > { %v801_v9 = vadd.f32 1e-05, %v799_v7 }
 0x179   : > { %v802_v10 = vadd.f32 1e-05, %v800_v8 }
 0x17a   : > { %1193 = vrsqrt.f32 %v801_v9 }
 0x17b   : > { %1195 = vrsqrt.f32 %v802_v10 }
 0x184   : > { %v1194_v11 = vpop.eup %1193 }
 0x185   : > { %v1196_v12 = vpop.eup %1195  ;;  %v805_v13 = vmul.f32 %v1194_v11, %v777_v49  ;;  %v807_v14 = vmul.f32 %v1194_v11, %v779_v50 }
 0x186   : > { %v806_v15 = vmul.f32 %v1196_v12, %v778_v51  ;;  %v808_v16 = vmul.f32 %v1196_v12, %v780_v52 }
 0x187   : > { %vm809_vm0 = vcmp.gt.f32.partialorder %v805_v13, 0.0  ;;  %v813_v17 = vmul.f32 0.2, %v805_v13  ;;  %vm811_vm1 = vcmp.gt.f32.partialorder %v807_v14, 0.0  ;;  %v815_v18 = vmul.f32 0.2, %v807_v14 }
 0x188   : > { %vm810_vm2 = vcmp.gt.f32.partialorder %v806_v15, 0.0  ;;  %v814_v19 = vmul.f32 0.2, %v806_v15  ;;  %vm812_vm3 = vcmp.gt.f32.partialorder %v808_v16, 0.0  ;;  %v816_v20 = vmul.f32 0.2, %v808_v16 }
 0x189   : > { %v817_v21 = vsel %vm809_vm0, %v805_v13, %v813_v17  ;;  %v819_v22 = vsel %vm811_vm1, %v807_v14, %v815_v18 }
 0x18a   : > { %821 = vst [vmem:[%s1343_s25] sm:$0xff] %v817_v21  ;;  %v818_v23 = vsel %vm810_vm2, %v806_v15, %v814_v19  ;;  %823 = vst [vmem:[%s1343_s25 + $0x10] sm:$0xff] %v819_v22  ;;  %v820_v24 = vsel %vm812_vm3, %v808_v16, %v816_v20 }
 0x18b   : > { %822 = vst [vmem:[%s1343_s25 + $0x8] sm:$0xff] %v818_v23  ;;  %824 = vst [vmem:[%s1343_s25 + $0x18] sm:$0xff] %v820_v24 }
 0x18c PF: > { %s12_s15 = sadd.s32 1, %s1251_s15   ;;  %s1445_s9 = smov %s1231_s10 }
 0x18d   : > { %p9_p0 = scmp.ge.s32.totalorder %s12_s15, 10   ;;  %s1446_s10 = smov %s1320_s22 }
 0x18e   : > { %s1447_s11 = smov %s1243_s13  ;;  %s1448_s12 = smov %s1247_s14 }
 0x18f   : > { %s1449_s13 = smov %s1452_s16  ;;  %s1450_s14 = smov %s1456_s17 }
 0x190   :  { %11 = sbr.rel (!%p9_p0) target bundleno = 4 (0x4), region = 97 }

// kernel: discriminator_forward.8
= control target key start
LH: loop header
LB: loop body
LE: loop exit
PB: predicated region body
PF: predicated region fallthrough
CT: control target
= control target key end

     0   :  { %s1895_s9 = smov 0   ;;  %s1897_s10 = smov 0   ;;  %s2106_s0 = inlined_call_operand.vmem [shape: bf16[2,4,4096], index: 0, kind: input, shape index: {}]   ;;  %s2107_s1 = inlined_call_operand.vmem [shape: bf16[4096,512], index: 1, kind: input, shape index: {}]   ;;  %s2108_s2 = inlined_call_operand.vmem [shape: f32[2,4,512], index: 2, kind: output, shape index: {}]  }
   0x1   :  { %s1899_s11 = smov 0   ;;  %s1901_s12 = smov 0  }
   0x2   :  { %s1903_s13 = smov 0  }
   0x3 LB: > { %s24_s14 = sadd.s32 1, %s1868_s11  ;;  %s31_s15 = sadd.s32 1, %s1872_s12  ;;  %s1876_s13 = sphi %s1903_s13, %s12_s13   ;;  %s1872_s12 = sphi %s1901_s12, %s2112_s12   ;;  %s1868_s11 = sphi %s1899_s11, %s2111_s11   ;;  %s1864_s10 = sphi %s1897_s10, %s2110_s10   ;;  %s1860_s9 = sphi %s1895_s9, %s2109_s9  }
   0x4   : > { %p25_p0 = scmp.ge.s32.totalorder %s24_s14, 8  ;;  %p1442_p1 = scmp.ge.s32.totalorder %s1876_s13, 1 }
   0x5   : > { %p158_p2 = scmp.lt.s32.totalorder %s1876_s13, 17 }
   0x6   : > { %s2114_s14 = smov (%p25_p0, %s24_s14), 0  ;;  %s2116_s15 = smov (!%p25_p0, %s31_s15), %s1872_s12 }
   0x7   : > { %p159_p3 = pnand %p1442_p1, %p158_p2  ;;  %p33_p4 = scmp.ge.s32.totalorder %s2116_s15, 2 }
   0x8   : > { %s1443_s16 = sshll.u32 (!%p159_p3), %s1860_s9, 2  ;;  %p199_p5 = scmp.lt.s32.totalorder (!%p159_p3), %s1864_s10, 1 }
   0x9   : > { %s2118_s15 = smov (%p33_p4, %s2116_s15), 0  ;;  %162 = sbr.rel (%p159_p3) target bundleno = 444 (0x1bc), region = 28 }
   0xa   : > { %p203_p6 = scmp.lt.s32.totalorder (!%p159_p3), %s1443_s16, 31  ;;  %s1446_s17 = sshll.u32 (!%p159_p3), %s1860_s9, 6 }
   0xb   : > { %p213_p7 = scmp.lt.s32.totalorder (!%p159_p3), %s1446_s17, 511  ;;  %p1451_p8 = scmp.ne.s32.totalorder (!%p159_p3), %s1860_s9, 0 }
  0x10   : > { %s2120_s10 = smov (!%p199_p5, %s1864_s10), 1  ;;  %s2122_s16 = smov (!%p203_p6, %s1443_s16), 31 }
  0x11   : > { %s1444_s18 = sshll.u32 %s2120_s10, 5  ;;  %s1584_s20 = sshll.u32 %s2120_s10, 4  ;;  %v1878_v0 = vmov (!%p1451_p8), 0.0  }
  0x12   : > { %s208_s19 = sadd.s32 %s1444_s18, %s2122_s16  ;;  %s1932_s24 = scalar_lea.vmem %s2108_s2, %s1584_s20  ;;  %232 = vst [vmem:[#allocation2] sm:$0xff] (!%p1451_p8), %v1878_v0  ;;  %233 = vst [vmem:[#allocation2 + $0x8] sm:$0xff] (!%p1451_p8), %v1878_v0 }
  0x13   : > { %s1445_s21 = sshll.u32 %s208_s19, 1  ;;  %s2124_s17 = smov (!%p213_p7, %s1446_s17), 511 }
  0x14   : > { %s1937_s27 = scalar_lea.vmem %s2106_s0, %s1445_s21  ;;  %s1583_s28 = sshll.u32 %s2124_s17, 4 }
  0x15   : > { %s1942_s3 = scalar_lea.vmem %s2107_s1, %s1583_s28  ;;  %231 = sbr.rel (%p1451_p8) target bundleno = 28 (0x1c), region = 32 }
  0x1c PF: > { %v1635_v1 = vld [vmem:[%s1942_s3 + $0x4] ss:$16 sps:$4 sm:$0xff]   ;;  %v1637_v2 = vld [vmem:[%s1942_s3 + $0xc] ss:$16 sps:$4 sm:$0xff]   ;;  %v1639_v3 = vld [vmem:[%s1942_s3] ss:$16 sps:$4 sm:$0xff]   ;;  %v370_v39 = vlaneseq }
  0x1d   : > { %1027 = vmatprep.subr.bf16.mxu0 %v1635_v1  ;;  %v1640_v4 = vld [vmem:[%s1942_s3 + $0x8] ss:$16 sps:$4 sm:$0xff]   ;;  %1109 = vmatprep.subr.bf16.mxu1 %v1637_v2  ;;  %v1641_v5 = vld [vmem:[%s1942_s3 + $0x24] ss:$16 sps:$4 sm:$0xff]   ;;  %v1643_v6 = vld [vmem:[%s1942_s3 + $0x2c] ss:$16 sps:$4 sm:$0xff]  }
  0x1e   : > { %1028 = vmatpush1.bf16.msra.mxu0 %v1639_v3  ;;  %1110 = vmatpush1.bf16.msra.mxu1 %v1640_v4  ;;  %v1645_v7 = vld [vmem:[%s1942_s3 + $0x20] ss:$16 sps:$4 sm:$0xff]   ;;  %v1646_v8 = vld [vmem:[%s1942_s3 + $0x28] ss:$16 sps:$4 sm:$0xff]   ;;  %v1647_v9 = vld [vmem:[%s1942_s3 + $0x44] ss:$16 sps:$4 sm:$0xff]  }
  0x1f   : > { %1029 = vmatprep.subr.bf16.mxu0 %v1641_v5  ;;  %1111 = vmatprep.subr.bf16.mxu1 %v1643_v6  ;;  %v1649_v10 = vld [vmem:[%s1942_s3 + $0x4c] ss:$16 sps:$4 sm:$0xff]   ;;  %v1651_v11 = vld [vmem:[%s1942_s3 + $0x40] ss:$16 sps:$4 sm:$0xff]   ;;  %v1652_v12 = vld [vmem:[%s1942_s3 + $0x48] ss:$16 sps:$4 sm:$0xff]  }
  0x20   : > { %v1653_v13 = vld [vmem:[%s1942_s3 + $0x64] ss:$16 sps:$4 sm:$0xff]   ;;  %v1655_v14 = vld [vmem:[%s1942_s3 + $0x6c] ss:$16 sps:$4 sm:$0xff]   ;;  %v1657_v15 = vld [vmem:[%s1942_s3 + $0x60] ss:$16 sps:$4 sm:$0xff]  }
  0x21   : > { %v1658_v16 = vld [vmem:[%s1942_s3 + $0x68] ss:$16 sps:$4 sm:$0xff]   ;;  %v1659_v17 = vld [vmem:[%s1942_s3 + $0x84] ss:$16 sps:$4 sm:$0xff]   ;;  %v1661_v18 = vld [vmem:[%s1942_s3 + $0x8c] ss:$16 sps:$4 sm:$0xff]  }
  0x22   : > { %1030 = vmatpush1.bf16.msra.mxu0 %v1645_v7  ;;  %1112 = vmatpush1.bf16.msra.mxu1 %v1646_v8  ;;  %v1663_v19 = vld [vmem:[%s1942_s3 + $0x80] ss:$16 sps:$4 sm:$0xff]   ;;  %v1664_v20 = vld [vmem:[%s1942_s3 + $0x88] ss:$16 sps:$4 sm:$0xff]   ;;  %v1665_v21 = vld [vmem:[%s1942_s3 + $0xa4] ss:$16 sps:$4 sm:$0xff]  }
  0x23   : > { %1031 = vmatprep.subr.bf16.mxu0 %v1647_v9  ;;  %1113 = vmatprep.subr.bf16.mxu1 %v1649_v10  ;;  %v1667_v22 = vld [vmem:[%s1942_s3 + $0xac] ss:$16 sps:$4 sm:$0xff]   ;;  %v1669_v23 = vld [vmem:[%s1942_s3 + $0xa0] ss:$16 sps:$4 sm:$0xff]   ;;  %v1670_v24 = vld [vmem:[%s1942_s3 + $0xa8] ss:$16 sps:$4 sm:$0xff]  }
  0x24   : > { %v1671_v25 = vld [vmem:[%s1942_s3 + $0xc4] ss:$16 sps:$4 sm:$0xff]   ;;  %v1673_v26 = vld [vmem:[%s1942_s3 + $0xcc] ss:$16 sps:$4 sm:$0xff]   ;;  %v1675_v27 = vld [vmem:[%s1942_s3 + $0xc0] ss:$16 sps:$4 sm:$0xff]  }
  0x25   : > { %v1676_v28 = vld [vmem:[%s1942_s3 + $0xc8] ss:$16 sps:$4 sm:$0xff]   ;;  %v1677_v29 = vld [vmem:[%s1942_s3 + $0xe4] ss:$16 sps:$4 sm:$0xff]   ;;  %v1679_v30 = vld [vmem:[%s1942_s3 + $0xec] ss:$16 sps:$4 sm:$0xff]  }
  0x26   : > { %1032 = vmatpush1.bf16.msra.mxu0 %v1651_v11  ;;  %1114 = vmatpush1.bf16.msra.mxu1 %v1652_v12  ;;  %v1681_v31 = vld [vmem:[%s1942_s3 + $0xe0] ss:$16 sps:$4 sm:$0xff]   ;;  %v1682_v32 = vld [vmem:[%s1942_s3 + $0xe8] ss:$16 sps:$4 sm:$0xff]   ;;  %v1683_v33 = vld [vmem:[%s1942_s3 + $0x104] ss:$16 sps:$4 sm:$0xff]  }
  0x27   : > { %1033 = vmatprep.subr.bf16.mxu0 %v1653_v13  ;;  %1115 = vmatprep.subr.bf16.mxu1 %v1655_v14  ;;  %v1685_v34 = vld [vmem:[%s1942_s3 + $0x10c] ss:$16 sps:$4 sm:$0xff]   ;;  %v1687_v35 = vld [vmem:[%s1942_s3 + $0x100] ss:$16 sps:$4 sm:$0xff]   ;;  %v1688_v36 = vld [vmem:[%s1942_s3 + $0x108] ss:$16 sps:$4 sm:$0xff]  }
  0x28   : > { %v1879_v37 = vmov 1983009808   ;;  %v1689_v40 = vld [vmem:[%s1942_s3 + $0x124] ss:$16 sps:$4 sm:$0xff]   ;;  %v1691_v41 = vld [vmem:[%s1942_s3 + $0x12c] ss:$16 sps:$4 sm:$0xff]  }
  0x29   : > { %v368_v38 = vunpack.c.l.s4 %v1879_v37  ;;  %v1693_v42 = vld [vmem:[%s1942_s3 + $0x120] ss:$16 sps:$4 sm:$0xff]   ;;  %v371_v44 = vshrl.u32 %v370_v39, 7  ;;  %v1694_v45 = vld [vmem:[%s1942_s3 + $0x128] ss:$16 sps:$4 sm:$0xff]   ;;  %p1580_p9 = scmp.ne.s32.totalorder %s1860_s9, 7 }
  0x2a   : > { %1034 = vmatpush1.bf16.msra.mxu0 %v1657_v15  ;;  %1116 = vmatpush1.bf16.msra.mxu1 %v1658_v16  ;;  %v1695_v46 = vld [vmem:[%s1942_s3 + $0x144] ss:$16 sps:$4 sm:$0xff]   ;;  %v1697_v47 = vld [vmem:[%s1942_s3 + $0x14c] ss:$16 sps:$4 sm:$0xff]   ;;  %v1699_v48 = vld [vmem:[%s1942_s3 + $0x140] ss:$16 sps:$4 sm:$0xff]  }
  0x2b   : > { %1035 = vmatprep.subr.bf16.mxu0 %v1659_v17  ;;  %1117 = vmatprep.subr.bf16.mxu1 %v1661_v18  ;;  %v369_v43 = vunpack.c.0.s8 %v368_v38  ;;  %v1700_v49 = vld [vmem:[%s1942_s3 + $0x148] ss:$16 sps:$4 sm:$0xff]   ;;  %v1701_v51 = vld [vmem:[%s1942_s3 + $0x164] ss:$16 sps:$4 sm:$0xff]   ;;  %v1703_v52 = vld [vmem:[%s1942_s3 + $0x16c] ss:$16 sps:$4 sm:$0xff]  }
  0x2c   : > { %v236_v53 = vld [vmem:[%s1937_s27] sm:$0xff]  ;;  %v1706_v56 = vld [vmem:[%s1942_s3 + $0x168] ss:$16 sps:$4 sm:$0xff]   ;;  %v1709_v58 = vld [vmem:[%s1942_s3 + $0x18c] ss:$16 sps:$4 sm:$0xff]   ;;  %vm1215_vm0 = vcmask (!%p1580_p9), 1043456  }
  0x2d   : > { %v372_v50 = vsub.s32 %v369_v43, %v371_v44  ;;  %v1705_v54 = vld [vmem:[%s1942_s3 + $0x160] ss:$16 sps:$4 sm:$0xff]   ;;  %v1707_v57 = vld [vmem:[%s1942_s3 + $0x184] ss:$16 sps:$4 sm:$0xff]   ;;  %v1712_v61 = vld [vmem:[%s1942_s3 + $0x188] ss:$16 sps:$4 sm:$0xff]   ;;  %v366_v8 = vcombine.high %v236_v53, %v236_v53 }
  0x2e   : > { %1036 = vmatpush1.bf16.msra.mxu0 %v1663_v19  ;;  %1118 = vmatpush1.bf16.msra.mxu1 %v1664_v20  ;;  %v1711_v60 = vld [vmem:[%s1942_s3 + $0x180] ss:$16 sps:$4 sm:$0xff]   ;;  %v1713_v62 = vld [vmem:[%s1942_s3 + $0x1a4] ss:$16 sps:$4 sm:$0xff]   ;;  %v1715_v63 = vld [vmem:[%s1942_s3 + $0x1ac] ss:$16 sps:$4 sm:$0xff]  }
  0x2f   : > { %1037 = vmatprep.subr.bf16.mxu0 %v1665_v21  ;;  %1119 = vmatprep.subr.bf16.mxu1 %v1667_v22  ;;  %v373_v55 = vrot.slane %v236_v53, %v372_v50  ;;  %v1717_v0 = vld [vmem:[%s1942_s3 + $0x1a0] ss:$16 sps:$4 sm:$0xff]   ;;  %v1718_v1 = vld [vmem:[%s1942_s3 + $0x1a8] ss:$16 sps:$4 sm:$0xff]   ;;  %v1719_v2 = vld [vmem:[%s1942_s3 + $0x1c4] ss:$16 sps:$4 sm:$0xff]   ;;  %v2012_v13 = vrot.slane %v366_v8, %v372_v50 }
  0x30   : > { %v1721_v3 = vld [vmem:[%s1942_s3 + $0x1cc] ss:$16 sps:$4 sm:$0xff]   ;;  %v1723_v4 = vld [vmem:[%s1942_s3 + $0x1c0] ss:$16 sps:$4 sm:$0xff]   ;;  %v1724_v5 = vld [vmem:[%s1942_s3 + $0x1c8] ss:$16 sps:$4 sm:$0xff]  }
  0x31   : > { %v381_v59 = vcombine.high %v373_v55, %v373_v55  ;;  %v1725_v6 = vld [vmem:[%s1942_s3 + $0x1e4] ss:$16 sps:$4 sm:$0xff]   ;;  %v1727_v7 = vld [vmem:[%s1942_s3 + $0x1ec] ss:$16 sps:$4 sm:$0xff]   ;;  %v1729_v9 = vld [vmem:[%s1942_s3 + $0x1e0] ss:$16 sps:$4 sm:$0xff]   ;;  %v382_v18 = vcombine.high %v2012_v13, %v2012_v13 }
  0x32   : > { %1038 = vmatpush1.bf16.msra.mxu0 %v1669_v23  ;;  %1120 = vmatpush1.bf16.msra.mxu1 %v1670_v24  ;;  %v1730_v10 = vld [vmem:[%s1942_s3 + $0x1e8] ss:$16 sps:$4 sm:$0xff]   ;;  %v1734_v11 = vld [vmem:[%s1942_s3 + $0x204] ss:$16 sps:$4 sm:$0xff]   ;;  %v1737_v12 = vld [vmem:[%s1942_s3 + $0x20c] ss:$16 sps:$4 sm:$0xff]  }
  0x33   : > { %1039 = vmatprep.subr.bf16.mxu0 %v1671_v25  ;;  %1121 = vmatprep.subr.bf16.mxu1 %v1673_v26  ;;  %v1732_v14 = vld [vmem:[%s1942_s3 + $0x200] ss:$16 sps:$4 sm:$0xff]   ;;  %v1735_v15 = vld [vmem:[%s1942_s3 + $0x208] ss:$16 sps:$4 sm:$0xff]   ;;  %v1740_v16 = vld [vmem:[%s1942_s3 + $0x224] ss:$16 sps:$4 sm:$0xff]  }
  0x34   : > { %1059 = vmatprep.mubr.bf16.mxu0 %v381_v59  ;;  %1141 = vmatprep.mubr.bf16.mxu1 %v381_v59  ;;  %v1743_v17 = vld [vmem:[%s1942_s3 + $0x22c] ss:$16 sps:$4 sm:$0xff]   ;;  %v1738_v19 = vld [vmem:[%s1942_s3 + $0x220] ss:$16 sps:$4 sm:$0xff]   ;;  %v1741_v20 = vld [vmem:[%s1942_s3 + $0x228] ss:$16 sps:$4 sm:$0xff]  }
  0x35   : > { %v1746_v21 = vld [vmem:[%s1942_s3 + $0x244] ss:$16 sps:$4 sm:$0xff]   ;;  %v1749_v22 = vld [vmem:[%s1942_s3 + $0x24c] ss:$16 sps:$4 sm:$0xff]   ;;  %v1744_v23 = vld [vmem:[%s1942_s3 + $0x240] ss:$16 sps:$4 sm:$0xff]  }
  0x36   : > { %1040 = vmatpush1.bf16.msra.mxu0 %v1675_v27  ;;  %1122 = vmatpush1.bf16.msra.mxu1 %v1676_v28  ;;  %v1747_v24 = vld [vmem:[%s1942_s3 + $0x248] ss:$16 sps:$4 sm:$0xff]   ;;  %v1752_v25 = vld [vmem:[%s1942_s3 + $0x264] ss:$16 sps:$4 sm:$0xff]   ;;  %v1755_v26 = vld [vmem:[%s1942_s3 + $0x26c] ss:$16 sps:$4 sm:$0xff]  }
  0x37   : > { %1041 = vmatprep.subr.bf16.mxu0 %v1677_v29  ;;  %1123 = vmatprep.subr.bf16.mxu1 %v1679_v30  ;;  %v1750_v27 = vld [vmem:[%s1942_s3 + $0x260] ss:$16 sps:$4 sm:$0xff]   ;;  %v1753_v28 = vld [vmem:[%s1942_s3 + $0x268] ss:$16 sps:$4 sm:$0xff]   ;;  %v1758_v29 = vld [vmem:[%s1942_s3 + $0x284] ss:$16 sps:$4 sm:$0xff]  }
  0x38   : > { %v1761_v30 = vld [vmem:[%s1942_s3 + $0x28c] ss:$16 sps:$4 sm:$0xff]   ;;  %v1770_v37 = vld [vmem:[%s1942_s3 + $0x2c4] ss:$16 sps:$4 sm:$0xff]   ;;  %v1768_v39 = vld [vmem:[%s1942_s3 + $0x2c0] ss:$16 sps:$4 sm:$0xff]  }
  0x39   : > { %v1773_v38 = vld [vmem:[%s1942_s3 + $0x2cc] ss:$16 sps:$4 sm:$0xff]   ;;  %v1774_v43 = vld [vmem:[%s1942_s3 + $0x2e0] ss:$16 sps:$4 sm:$0xff]   ;;  %v1777_v44 = vld [vmem:[%s1942_s3 + $0x2e8] ss:$16 sps:$4 sm:$0xff]  }
  0x3a   : > { %1042 = vmatpush1.bf16.msra.mxu0 %v1681_v31  ;;  %1124 = vmatpush1.bf16.msra.mxu1 %v1682_v32  ;;  %v1756_v31 = vld [vmem:[%s1942_s3 + $0x280] ss:$16 sps:$4 sm:$0xff]   ;;  %v1759_v32 = vld [vmem:[%s1942_s3 + $0x288] ss:$16 sps:$4 sm:$0xff]   ;;  %v1791_v50 = vld [vmem:[%s1942_s3 + $0x32c] ss:$16 sps:$4 sm:$0xff]  }
  0x3b   : > { %1043 = vmatprep.subr.bf16.mxu0 %v1683_v33  ;;  %1125 = vmatprep.subr.bf16.mxu1 %v1685_v34  ;;  %v1764_v33 = vld [vmem:[%s1942_s3 + $0x2a4] ss:$16 sps:$4 sm:$0xff]   ;;  %v1767_v34 = vld [vmem:[%s1942_s3 + $0x2ac] ss:$16 sps:$4 sm:$0xff]   ;;  %v1798_v59 = vld [vmem:[%s1942_s3 + $0x360] ss:$16 sps:$4 sm:$0xff]  }
  0x3c   : > { %v1794_v53 = vld [vmem:[%s1942_s3 + $0x344] ss:$16 sps:$4 sm:$0xff]   ;;  %v1819_v8 = vld [vmem:[%s1942_s3 + $0x3c8] ss:$16 sps:$4 sm:$0xff]  }
  0x3e   : > { %1044 = vmatpush1.bf16.msra.mxu0 %v1687_v35  ;;  %1126 = vmatpush1.bf16.msra.mxu1 %v1688_v36  ;;  %v1762_v35 = vld [vmem:[%s1942_s3 + $0x2a0] ss:$16 sps:$4 sm:$0xff]   ;;  %v1765_v36 = vld [vmem:[%s1942_s3 + $0x2a8] ss:$16 sps:$4 sm:$0xff]  }
  0x3f   : > { %1045 = vmatprep.subr.bf16.mxu0 %v1689_v40  ;;  %1127 = vmatprep.subr.bf16.mxu1 %v1691_v41  ;;  %v1771_v40 = vld [vmem:[%s1942_s3 + $0x2c8] ss:$16 sps:$4 sm:$0xff]   ;;  %v1776_v41 = vld [vmem:[%s1942_s3 + $0x2e4] ss:$16 sps:$4 sm:$0xff]  }
  0x42   : > { %1046 = vmatpush1.bf16.msra.mxu0 %v1693_v42  ;;  %1128 = vmatpush1.bf16.msra.mxu1 %v1694_v45  ;;  %v1779_v42 = vld [vmem:[%s1942_s3 + $0x2ec] ss:$16 sps:$4 sm:$0xff]   ;;  %v1782_v45 = vld [vmem:[%s1942_s3 + $0x304] ss:$16 sps:$4 sm:$0xff]  }
  0x43   : > { %1047 = vmatprep.subr.bf16.mxu0 %v1695_v46  ;;  %1129 = vmatprep.subr.bf16.mxu1 %v1697_v47  ;;  %v1785_v46 = vld [vmem:[%s1942_s3 + $0x30c] ss:$16 sps:$4 sm:$0xff]   ;;  %v1780_v47 = vld [vmem:[%s1942_s3 + $0x300] ss:$16 sps:$4 sm:$0xff]  }
  0x46   : > { %1048 = vmatpush1.bf16.msra.mxu0 %v1699_v48  ;;  %1130 = vmatpush1.bf16.msra.mxu1 %v1700_v49  ;;  %v1783_v48 = vld [vmem:[%s1942_s3 + $0x308] ss:$16 sps:$4 sm:$0xff]   ;;  %v1788_v49 = vld [vmem:[%s1942_s3 + $0x324] ss:$16 sps:$4 sm:$0xff]  }
  0x47   : > { %1049 = vmatprep.subr.bf16.mxu0 %v1701_v51  ;;  %1131 = vmatprep.subr.bf16.mxu1 %v1703_v52  ;;  %v1786_v51 = vld [vmem:[%s1942_s3 + $0x320] ss:$16 sps:$4 sm:$0xff]   ;;  %v1789_v52 = vld [vmem:[%s1942_s3 + $0x328] ss:$16 sps:$4 sm:$0xff]  }
  0x4a   : > { %1050 = vmatpush1.bf16.msra.mxu0 %v1705_v54  ;;  %1132 = vmatpush1.bf16.msra.mxu1 %v1706_v56  ;;  %v1797_v54 = vld [vmem:[%s1942_s3 + $0x34c] ss:$16 sps:$4 sm:$0xff]   ;;  %v1795_v56 = vld [vmem:[%s1942_s3 + $0x348] ss:$16 sps:$4 sm:$0xff]  }
  0x4b   : > { %1051 = vmatprep.subr.bf16.mxu0 %v1707_v57  ;;  %1133 = vmatprep.subr.bf16.mxu1 %v1709_v58  ;;  %v1800_v57 = vld [vmem:[%s1942_s3 + $0x364] ss:$16 sps:$4 sm:$0xff]   ;;  %v1803_v58 = vld [vmem:[%s1942_s3 + $0x36c] ss:$16 sps:$4 sm:$0xff]  }
  0x4e   : > { %1052 = vmatpush1.bf16.msra.mxu0 %v1711_v60  ;;  %1134 = vmatpush1.bf16.msra.mxu1 %v1712_v61  ;;  %v1801_v60 = vld [vmem:[%s1942_s3 + $0x368] ss:$16 sps:$4 sm:$0xff]   ;;  %v1806_v61 = vld [vmem:[%s1942_s3 + $0x384] ss:$16 sps:$4 sm:$0xff]  }
  0x4f   : > { %1053 = vmatprep.subr.bf16.mxu0 %v1713_v62  ;;  %1135 = vmatprep.subr.bf16.mxu1 %v1715_v63  ;;  %v1809_v62 = vld [vmem:[%s1942_s3 + $0x38c] ss:$16 sps:$4 sm:$0xff]   ;;  %v1804_v63 = vld [vmem:[%s1942_s3 + $0x380] ss:$16 sps:$4 sm:$0xff]  }
  0x52   : > { %1054 = vmatpush1.bf16.msra.mxu0 %v1717_v0  ;;  %1136 = vmatpush1.bf16.msra.mxu1 %v1718_v1  ;;  %v1807_v0 = vld [vmem:[%s1942_s3 + $0x388] ss:$16 sps:$4 sm:$0xff]   ;;  %v1812_v1 = vld [vmem:[%s1942_s3 + $0x3a4] ss:$16 sps:$4 sm:$0xff]  }
  0x53   : > { %1055 = vmatprep.subr.bf16.mxu0 %v1719_v2  ;;  %1137 = vmatprep.subr.bf16.mxu1 %v1721_v3  ;;  %v1815_v2 = vld [vmem:[%s1942_s3 + $0x3ac] ss:$16 sps:$4 sm:$0xff]   ;;  %v1810_v3 = vld [vmem:[%s1942_s3 + $0x3a0] ss:$16 sps:$4 sm:$0xff]  }
  0x56   : > { %1056 = vmatpush1.bf16.msra.mxu0 %v1723_v4  ;;  %1138 = vmatpush1.bf16.msra.mxu1 %v1724_v5  ;;  %v1813_v4 = vld [vmem:[%s1942_s3 + $0x3a8] ss:$16 sps:$4 sm:$0xff]   ;;  %v1818_v5 = vld [vmem:[%s1942_s3 + $0x3c4] ss:$16 sps:$4 sm:$0xff]  }
  0x57   : > { %1057 = vmatprep.subr.bf16.mxu0 %v1725_v6  ;;  %1139 = vmatprep.subr.bf16.mxu1 %v1727_v7  ;;  %v1821_v6 = vld [vmem:[%s1942_s3 + $0x3cc] ss:$16 sps:$4 sm:$0xff]   ;;  %v1816_v7 = vld [vmem:[%s1942_s3 + $0x3c0] ss:$16 sps:$4 sm:$0xff]  }
  0x5a   : > { %1058 = vmatpush1.bf16.msra.mxu0 %v1729_v9  ;;  %1140 = vmatpush1.bf16.msra.mxu1 %v1730_v10  ;;  %v1824_v9 = vld [vmem:[%s1942_s3 + $0x3e4] ss:$16 sps:$4 sm:$0xff]   ;;  %v1827_v10 = vld [vmem:[%s1942_s3 + $0x3ec] ss:$16 sps:$4 sm:$0xff]  }
  0x5b   : > { %1068 = vmatprep.subr.bf16.mxu0 %v1734_v11  ;;  %1150 = vmatprep.subr.bf16.mxu1 %v1737_v12  ;;  %v1822_v11 = vld [vmem:[%s1942_s3 + $0x3e0] ss:$16 sps:$4 sm:$0xff]   ;;  %v1825_v12 = vld [vmem:[%s1942_s3 + $0x3e8] ss:$16 sps:$4 sm:$0xff]  }
  0x5d   : > { %1060 = vmatmul.mubr.bf16.vlgmr.msra.gmra.mrb[0].mxu0 %v373_v55  ;;  %1142 = vmatmul.mubr.bf16.vlgmr.msra.gmra.mrb[0].mxu1 %v373_v55  ;;  %v1792_v55 = vld [vmem:[%s1942_s3 + $0x340] ss:$16 sps:$4 sm:$0xff]  }
  0x5e   : > { %1069 = vmatpush1.bf16.msra.mxu0 %v1732_v14  ;;  %1151 = vmatpush1.bf16.msra.mxu1 %v1735_v15 }
  0x5f   : > { %1070 = vmatprep.subr.bf16.mxu0 %v1740_v16  ;;  %1152 = vmatprep.subr.bf16.mxu1 %v1743_v17  ;;  %v234_v16 = vld [vmem:[#allocation2] sm:$0xff] }
  0x60   : > { %1100 = vmatprep.mubr.bf16.mxu0 %v382_v18  ;;  %1182 = vmatprep.mubr.bf16.mxu1 %v382_v18  ;;  %v235_v18 = vld [vmem:[#allocation2 + $0x8] sm:$0xff] }
  0x62   : > { %1071 = vmatpush1.bf16.msra.mxu0 %v1738_v19  ;;  %1153 = vmatpush1.bf16.msra.mxu1 %v1741_v20 }
  0x63   : > { %1072 = vmatprep.subr.bf16.mxu0 %v1746_v21  ;;  %1154 = vmatprep.subr.bf16.mxu1 %v1749_v22 }
  0x66   : > { %1073 = vmatpush1.bf16.msra.mxu0 %v1744_v23  ;;  %1155 = vmatpush1.bf16.msra.mxu1 %v1747_v24 }
  0x67   : > { %1074 = vmatprep.subr.bf16.mxu0 %v1752_v25  ;;  %1156 = vmatprep.subr.bf16.mxu1 %v1755_v26 }
  0x6a   : > { %1075 = vmatpush1.bf16.msra.mxu0 %v1750_v27  ;;  %1157 = vmatpush1.bf16.msra.mxu1 %v1753_v28 }
  0x6b   : > { %1076 = vmatprep.subr.bf16.mxu0 %v1758_v29  ;;  %1158 = vmatprep.subr.bf16.mxu1 %v1761_v30 }
  0x6e   : > { %1077 = vmatpush1.bf16.msra.mxu0 %v1756_v31  ;;  %1159 = vmatpush1.bf16.msra.mxu1 %v1759_v32 }
  0x6f   : > { %1078 = vmatprep.subr.bf16.mxu0 %v1764_v33  ;;  %1160 = vmatprep.subr.bf16.mxu1 %v1767_v34 }
  0x72   : > { %1079 = vmatpush1.bf16.msra.mxu0 %v1762_v35  ;;  %1161 = vmatpush1.bf16.msra.mxu1 %v1765_v36 }
  0x73   : > { %1080 = vmatprep.subr.bf16.mxu0 %v1770_v37  ;;  %1162 = vmatprep.subr.bf16.mxu1 %v1773_v38 }
  0x76   : > { %1081 = vmatpush1.bf16.msra.mxu0 %v1768_v39  ;;  %1163 = vmatpush1.bf16.msra.mxu1 %v1771_v40 }
  0x77   : > { %1082 = vmatprep.subr.bf16.mxu0 %v1776_v41  ;;  %1164 = vmatprep.subr.bf16.mxu1 %v1779_v42 }
  0x7a   : > { %1083 = vmatpush1.bf16.msra.mxu0 %v1774_v43  ;;  %1165 = vmatpush1.bf16.msra.mxu1 %v1777_v44 }
  0x7b   : > { %1084 = vmatprep.subr.bf16.mxu0 %v1782_v45  ;;  %1166 = vmatprep.subr.bf16.mxu1 %v1785_v46 }
  0x7e   : > { %1085 = vmatpush1.bf16.msra.mxu0 %v1780_v47  ;;  %1167 = vmatpush1.bf16.msra.mxu1 %v1783_v48 }
  0x7f   : > { %1086 = vmatprep.subr.bf16.mxu0 %v1788_v49  ;;  %1168 = vmatprep.subr.bf16.mxu1 %v1791_v50 }
  0x82   : > { %1087 = vmatpush1.bf16.msra.mxu0 %v1786_v51  ;;  %1169 = vmatpush1.bf16.msra.mxu1 %v1789_v52 }
  0x83   : > { %1088 = vmatprep.subr.bf16.mxu0 %v1794_v53  ;;  %1170 = vmatprep.subr.bf16.mxu1 %v1797_v54 }
  0x86   : > { %1089 = vmatpush1.bf16.msra.mxu0 %v1792_v55  ;;  %1171 = vmatpush1.bf16.msra.mxu1 %v1795_v56 }
  0x87   : > { %1090 = vmatprep.subr.bf16.mxu0 %v1800_v57  ;;  %1172 = vmatprep.subr.bf16.mxu1 %v1803_v58 }
  0x8a   : > { %1091 = vmatpush1.bf16.msra.mxu0 %v1798_v59  ;;  %1173 = vmatpush1.bf16.msra.mxu1 %v1801_v60 }
  0x8b   : > { %1092 = vmatprep.subr.bf16.mxu0 %v1806_v61  ;;  %1174 = vmatprep.subr.bf16.mxu1 %v1809_v62 }
  0x8e   : > { %1093 = vmatpush1.bf16.msra.mxu0 %v1804_v63  ;;  %1175 = vmatpush1.bf16.msra.mxu1 %v1807_v0 }
  0x8f   : > { %1094 = vmatprep.subr.bf16.mxu0 %v1812_v1  ;;  %1176 = vmatprep.subr.bf16.mxu1 %v1815_v2 }
  0x92   : > { %1095 = vmatpush1.bf16.msra.mxu0 %v1810_v3  ;;  %1177 = vmatpush1.bf16.msra.mxu1 %v1813_v4 }
  0x93   : > { %1096 = vmatprep.subr.bf16.mxu0 %v1818_v5  ;;  %1178 = vmatprep.subr.bf16.mxu1 %v1821_v6 }
  0x96   : > { %1097 = vmatpush1.bf16.msra.mxu0 %v1816_v7  ;;  %1179 = vmatpush1.bf16.msra.mxu1 %v1819_v8 }
  0x97   : > { %1098 = vmatprep.subr.bf16.mxu0 %v1824_v9  ;;  %1180 = vmatprep.subr.bf16.mxu1 %v1827_v10 }
  0x9a   : > { %1099 = vmatpush1.bf16.msra.mxu0 %v1822_v11  ;;  %1181 = vmatpush1.bf16.msra.mxu1 %v1825_v12 }
  0x9d   : > { %1101 = vmatmul.mubr.bf16.vlgmr.msra.gmra.mrb[0].mxu0 %v2012_v13  ;;  %1183 = vmatmul.mubr.bf16.vlgmr.msra.gmra.mrb[0].mxu1 %v2012_v13 }
 0x170   : > { %v1102_v14 = vpop.f32.mrb[0].mxu0  ;;  %v1184_v15 = vpop.f32.mrb[0].mxu1  ;;  %1206 = sbr.rel (%p1580_p9) target bundleno = 444 (0x1bc), region = 36 }
 0x171   : > { %v1104_v17 = vpop.f32.mrb[1].mxu0  ;;  %v1186_v19 = vpop.f32.mrb[1].mxu1 }
 0x172   : > { %v1195_v20 = vcombine.low %v1102_v14, %v1104_v17  ;;  %v1196_v21 = vcombine.low %v1184_v15, %v1186_v19  ;;  %v1106_v22 = vpop.f32.mrb[2].mxu0  ;;  %v1188_v23 = vpop.f32.mrb[2].mxu1 }
 0x173   : > { %v1107_v24 = vpop.f32.mrb[3].mxu0  ;;  %v1189_v25 = vpop.f32.mrb[3].mxu1 }
 0x174   : > { %v1199_v26 = vadd.f32 %v1195_v20, %v234_v16  ;;  %v1200_v27 = vadd.f32 %v1196_v21, %v235_v18 }
 0x176   : > { %1201 = vst [vmem:[#allocation2] sm:$0xff] %v1199_v26  ;;  %1202 = vst [vmem:[#allocation2 + $0x8] sm:$0xff] %v1200_v27 }
 0x17d   : > { %v1207_v13 = vld [vmem:[#allocation2] sm:$0xff]  ;;  %v1208_v28 = vld [vmem:[#allocation2 + $0x8] sm:$0xff] }
 0x17e   : > { %v1211_v29 = vcombine.high %v1207_v13, %v1207_v13  ;;  %v1216_v30 = vsel %vm1215_vm0, %v1207_v13, 0.0  ;;  %v1212_v31 = vcombine.high %v1208_v28, %v1208_v28  ;;  %v1230_v32 = vsel %vm1215_vm0, %v1208_v28, 0.0 }
 0x17f   : > { %v1217_v33 = vrot.slane %v1216_v30, 4  ;;  %v1231_v34 = vrot.slane %v1230_v32, 4 }
 0x180   : > { %v1223_v35 = vsel %vm1215_vm0, %v1211_v29, 0.0  ;;  %v1237_v36 = vsel %vm1215_vm0, %v1212_v31, 0.0 }
 0x181   : > { %v1218_v37 = vadd.f32 %v1217_v33, %v1216_v30  ;;  %v1224_v38 = vrot.slane %v1223_v35, 4  ;;  %v1232_v39 = vadd.f32 %v1231_v34, %v1230_v32  ;;  %v1238_v40 = vrot.slane %v1237_v36, 4 }
 0x183   : > { %v1219_v41 = vrot.slane %v1218_v37, 2  ;;  %v1225_v42 = vadd.f32 %v1224_v38, %v1223_v35  ;;  %v1233_v43 = vrot.slane %v1232_v39, 2  ;;  %v1239_v44 = vadd.f32 %v1238_v40, %v1237_v36 }
 0x185   : > { %v1220_v45 = vadd.f32 %v1219_v41, %v1218_v37  ;;  %v1226_v46 = vrot.slane %v1225_v42, 2  ;;  %v1234_v47 = vadd.f32 %v1233_v43, %v1232_v39  ;;  %v1240_v48 = vrot.slane %v1239_v44, 2 }
 0x187   : > { %v1221_v49 = vrot.slane %v1220_v45, 1  ;;  %v1227_v50 = vadd.f32 %v1226_v46, %v1225_v42  ;;  %v1235_v51 = vrot.slane %v1234_v47, 1  ;;  %v1241_v52 = vadd.f32 %v1240_v48, %v1239_v44 }
 0x189   : > { %v1222_v53 = vadd.f32 %v1221_v49, %v1220_v45  ;;  %v1228_v54 = vrot.slane %v1227_v50, 1  ;;  %v1236_v55 = vadd.f32 %v1235_v51, %v1234_v47  ;;  %v1242_v56 = vrot.slane %v1241_v52, 1 }
 0x18b   : > { %v1229_v57 = vadd.f32 %v1228_v54, %v1227_v50  ;;  %v1245_v58 = vmul.f32 0.25, %v1222_v53  ;;  %v1243_v59 = vadd.f32 %v1242_v56, %v1241_v52  ;;  %v1247_v60 = vmul.f32 0.25, %v1236_v55 }
 0x18d   : > { %v1246_v61 = vmul.f32 0.25, %v1229_v57  ;;  %v1248_v62 = vmul.f32 0.25, %v1243_v59 }
 0x18f   : > { %v1253_v63 = vcombine.low %v1245_v58, %v1246_v61  ;;  %v1254_v0 = vcombine.low %v1247_v60, %v1248_v62 }
 0x191   : > { %v1257_v1 = vsub.f32 %v1207_v13, %v1253_v63  ;;  %v1258_v2 = vsub.f32 %v1208_v28, %v1254_v0 }
 0x193   : > { %v1259_v3 = vmul.f32 %v1257_v1, %v1257_v1  ;;  %v1260_v4 = vmul.f32 %v1258_v2, %v1258_v2 }
 0x195   : > { %v1263_v5 = vcombine.high %v1259_v3, %v1259_v3  ;;  %v1267_v6 = vsel %vm1215_vm0, %v1259_v3, 0.0  ;;  %v1264_v7 = vcombine.high %v1260_v4, %v1260_v4  ;;  %v1281_v8 = vsel %vm1215_vm0, %v1260_v4, 0.0 }
 0x196   : > { %v1268_v9 = vrot.slane %v1267_v6, 4  ;;  %v1282_v10 = vrot.slane %v1281_v8, 4 }
 0x197   : > { %v1274_v11 = vsel %vm1215_vm0, %v1263_v5, 0.0  ;;  %v1288_v12 = vsel %vm1215_vm0, %v1264_v7, 0.0 }
 0x198   : > { %v1269_v14 = vadd.f32 %v1268_v9, %v1267_v6  ;;  %v1275_v15 = vrot.slane %v1274_v11, 4  ;;  %v1283_v16 = vadd.f32 %v1282_v10, %v1281_v8  ;;  %v1289_v17 = vrot.slane %v1288_v12, 4 }
 0x19a   : > { %v1270_v18 = vrot.slane %v1269_v14, 2  ;;  %v1276_v19 = vadd.f32 %v1275_v15, %v1274_v11  ;;  %v1284_v20 = vrot.slane %v1283_v16, 2  ;;  %v1290_v21 = vadd.f32 %v1289_v17, %v1288_v12 }
 0x19c   : > { %v1271_v22 = vadd.f32 %v1270_v18, %v1269_v14  ;;  %v1277_v23 = vrot.slane %v1276_v19, 2  ;;  %v1285_v24 = vadd.f32 %v1284_v20, %v1283_v16  ;;  %v1291_v25 = vrot.slane %v1290_v21, 2 }
 0x19e   : > { %v1272_v26 = vrot.slane %v1271_v22, 1  ;;  %v1278_v27 = vadd.f32 %v1277_v23, %v1276_v19  ;;  %v1286_v13 = vrot.slane %v1285_v24, 1  ;;  %v1292_v28 = vadd.f32 %v1291_v25, %v1290_v21 }
 0x1a0   : > { %v1273_v29 = vadd.f32 %v1272_v26, %v1271_v22  ;;  %v1279_v30 = vrot.slane %v1278_v27, 1  ;;  %v1287_v31 = vadd.f32 %v1286_v13, %v1285_v24  ;;  %v1293_v32 = vrot.slane %v1292_v28, 1 }
 0x1a2   : > { %v1280_v33 = vadd.f32 %v1279_v30, %v1278_v27  ;;  %v1295_v34 = vmul.f32 0.25, %v1273_v29  ;;  %v1294_v35 = vadd.f32 %v1293_v32, %v1292_v28  ;;  %v1297_v36 = vmul.f32 0.25, %v1287_v31 }
 0x1a4   : > { %v1296_v37 = vmul.f32 0.25, %v1280_v33  ;;  %v1299_v38 = vadd.f32 1e-05, %v1295_v34  ;;  %v1298_v39 = vmul.f32 0.25, %v1294_v35  ;;  %v1301_v40 = vadd.f32 1e-05, %v1297_v36 }
 0x1a6   : > { %v1300_v41 = vadd.f32 1e-05, %v1296_v37  ;;  %1830 = vrsqrt.f32 %v1299_v38  ;;  %v1302_v42 = vadd.f32 1e-05, %v1298_v39 }
 0x1a7   : > { %1832 = vrsqrt.f32 %v1301_v40 }
 0x1a8   : > { %1834 = vrsqrt.f32 %v1300_v41 }
 0x1a9   : > { %1836 = vrsqrt.f32 %v1302_v42 }
 0x1b0   : > { %v1831_v43 = vpop.eup %1830 }
 0x1b1   : > { %v1833_v44 = vpop.eup %1832 }
 0x1b2   : > { %v1835_v45 = vpop.eup %1834 }
 0x1b3   : > { %v1837_v46 = vpop.eup %1836  ;;  %v1311_v47 = vcombine.low %v1831_v43, %v1835_v45 }
 0x1b4   : > { %v1312_v48 = vcombine.low %v1833_v44, %v1837_v46 }
 0x1b5   : > { %v1315_v49 = vmul.f32 %v1311_v47, %v1257_v1 }
 0x1b6   : > { %v1316_v50 = vmul.f32 %v1312_v48, %v1258_v2 }
 0x1b7   : > { %vm1317_vm1 = vcmp.gt.f32.partialorder %v1315_v49, 0.0  ;;  %v1319_v51 = vmul.f32 0.2, %v1315_v49 }
 0x1b8   : > { %vm1318_vm2 = vcmp.gt.f32.partialorder %v1316_v50, 0.0  ;;  %v1320_v52 = vmul.f32 0.2, %v1316_v50 }
 0x1b9   : > { %v1321_v53 = vsel %vm1317_vm1, %v1315_v49, %v1319_v51 }
 0x1ba   : > { %1323 = vst [vmem:[%s1932_s24] sm:$0xff] %v1321_v53  ;;  %v1322_v54 = vsel %vm1318_vm2, %v1316_v50, %v1320_v52 }
 0x1bb   : > { %1324 = vst [vmem:[%s1932_s24 + $0x8] sm:$0xff] %v1322_v54 }
 0x1bc PF: > { %s12_s13 = sadd.s32 1, %s1876_s13   ;;  %s2109_s9 = smov %s1868_s11 }
 0x1bd   : > { %p9_p10 = scmp.ge.s32.totalorder %s12_s13, 18   ;;  %s2110_s10 = smov %s1872_s12 }
 0x1be   : > { %s2111_s11 = smov %s2114_s14  ;;  %s2112_s12 = smov %s2118_s15 }
 0x1bf   :  { %11 = sbr.rel (!%p9_p10) target bundleno = 3 (0x3), region = 69 }

// kernel: discriminator_forward.9
= control target key start
LH: loop header
LB: loop body
LE: loop exit
PB: predicated region body
PF: predicated region fallthrough
CT: control target
= control target key end

     0   :  { %s910_s9 = smov 0   ;;  %s912_s10 = smov 0   ;;  %s1021_s0 = inlined_call_operand.vmem [shape: bf16[2,1,8192], index: 0, kind: input, shape index: {}]   ;;  %s1022_s1 = inlined_call_operand.vmem [shape: bf16[8192,128], index: 1, kind: input, shape index: {}]   ;;  %s1023_s2 = inlined_call_operand.vmem [shape: f32[2,1,128], index: 2, kind: output, shape index: {}]  }
   0x1   :  { %s914_s11 = smov 0   ;;  %s916_s12 = smov 0  }
   0x2   :  { %s918_s13 = smov 0  }
   0x3 LB: > { %s24_s14 = sadd.s32 1, %s883_s11  ;;  %s31_s15 = sadd.s32 1, %s887_s12  ;;  %s891_s13 = sphi %s918_s13, %s12_s13   ;;  %s887_s12 = sphi %s916_s12, %s1027_s12   ;;  %s883_s11 = sphi %s914_s11, %s1026_s11   ;;  %s879_s10 = sphi %s912_s10, %s1025_s10   ;;  %s875_s9 = sphi %s910_s9, %s1024_s9  }
   0x4   : > { %p25_p0 = scmp.ge.s32.totalorder %s24_s14, 16  ;;  %p693_p1 = scmp.ge.s32.totalorder %s891_s13, 1 }
   0x5   : > { %p156_p2 = scmp.lt.s32.totalorder %s891_s13, 33 }
   0x6   : > { %s1029_s14 = smov (%p25_p0, %s24_s14), 0  ;;  %s1031_s15 = smov (!%p25_p0, %s31_s15), %s887_s12 }
   0x7   : > { %p157_p3 = pnand %p693_p1, %p156_p2  ;;  %p33_p4 = scmp.ge.s32.totalorder %s1031_s15, 2 }
   0x8   : > { %s694_s16 = sshll.u32 (!%p157_p3), %s875_s9, 2  ;;  %p192_p5 = scmp.lt.s32.totalorder (!%p157_p3), %s879_s10, 1 }
   0x9   : > { %s1033_s15 = smov (%p33_p4, %s1031_s15), 0  ;;  %160 = sbr.rel (%p157_p3) target bundleno = 290 (0x122), region = 28 }
   0xa   : > { %p196_p6 = scmp.lt.s32.totalorder (!%p157_p3), %s694_s16, 63  ;;  %s696_s17 = sshll.u32 (!%p157_p3), %s875_s9, 6 }
   0xb   : > { %p205_p7 = scmp.lt.s32.totalorder (!%p157_p3), %s696_s17, 1023  ;;  %p698_p8 = scmp.ne.s32.totalorder (!%p157_p3), %s875_s9, 0 }
  0x10   : > { %s1035_s10 = smov (!%p192_p5, %s879_s10), 1  ;;  %s1037_s16 = smov (!%p196_p6, %s694_s16), 63 }
  0x11   : > { %s695_s18 = sshll.u32 %s1035_s10, 6  ;;  %s215_s22 = scalar_lea.vmem %s1023_s2, %s1035_s10  ;;  %v893_v0 = vmov (!%p698_p8), 0.0  }
  0x12   : > { %s947_s19 = sadd.s32 %s695_s18, %s1037_s16  ;;  %s1039_s17 = smov (!%p205_p7, %s696_s17), 1023  ;;  %221 = vst [vmem:[#allocation2] sm:$0x1] (!%p698_p8), %v893_v0 }
  0x13   : > { %s202_s25 = scalar_lea.vmem %s1021_s0, %s947_s19  ;;  %s697_s26 = sshll.u32 %s1039_s17, 2 }
  0x14   : > { %s960_s29 = scalar_lea.vmem %s1022_s1, %s697_s26  ;;  %220 = sbr.rel (%p698_p8) target bundleno = 27 (0x1b), region = 32 }
  0x1b PF: > { %v821_v1 = vld [vmem:[%s960_s29 + $0x40] sm:$0xff]   ;;  %v825_v5 = vld [vmem:[%s960_s29 + $0x48] sm:$0xff]   ;;  %v829_v9 = vld [vmem:[%s960_s29 + $0x50] sm:$0xff]   ;;  %v300_v31 = vlaneseq  ;;  %v894_v35 = vmov 1966171168   ;;  %p732_p9 = scmp.ne.s32.totalorder %s875_s9, 15 }
  0x1c   : > { %v822_v2 = vld [vmem:[%s960_s29 + $0xc0] sm:$0xff]   ;;  %735 = vmatprep.subr.bf16.mxu0 %v821_v1  ;;  %v826_v6 = vld [vmem:[%s960_s29 + $0xc8] sm:$0xff]   ;;  %v830_v10 = vld [vmem:[%s960_s29 + $0xd0] sm:$0xff]   ;;  %v298_v36 = vunpack.c.l.s4 %v894_v35 }
  0x1d   : > { %v823_v3 = vld [vmem:[%s960_s29] sm:$0xff]   ;;  %757 = vmatprep.subr.bf16.mxu1 %v822_v2  ;;  %v827_v7 = vld [vmem:[%s960_s29 + $0x8] sm:$0xff]   ;;  %v831_v11 = vld [vmem:[%s960_s29 + $0x10] sm:$0xff]   ;;  %v301_v37 = vshrl.u32 %v300_v31, 7 }
  0x1e   : > { %v824_v4 = vld [vmem:[%s960_s29 + $0x80] sm:$0xff]   ;;  %736 = vmatpush3.bf16.msra.mxu0 %v823_v3  ;;  %v828_v8 = vld [vmem:[%s960_s29 + $0x88] sm:$0xff]   ;;  %v832_v12 = vld [vmem:[%s960_s29 + $0x90] sm:$0xff]   ;;  %v299_v39 = vunpack.c.0.s8 %v298_v36 }
  0x1f   : > { %758 = vmatpush3.bf16.msra.mxu1 %v824_v4  ;;  %737 = vmatprep.subr.bf16.mxu0 %v825_v5  ;;  %v833_v13 = vld [vmem:[%s960_s29 + $0x58] sm:$0xff]   ;;  %v837_v17 = vld [vmem:[%s960_s29 + $0x60] sm:$0xff]   ;;  %v841_v21 = vld [vmem:[%s960_s29 + $0x68] sm:$0xff]  }
  0x20   : > { %759 = vmatprep.subr.bf16.mxu1 %v826_v6  ;;  %v834_v14 = vld [vmem:[%s960_s29 + $0xd8] sm:$0xff]   ;;  %v838_v18 = vld [vmem:[%s960_s29 + $0xe0] sm:$0xff]   ;;  %v842_v22 = vld [vmem:[%s960_s29 + $0xe8] sm:$0xff]   ;;  %v302_v40 = vsub.s32 %v299_v39, %v301_v37 }
  0x21   : > { %v835_v15 = vld [vmem:[%s960_s29 + $0x18] sm:$0xff]   ;;  %v839_v19 = vld [vmem:[%s960_s29 + $0x20] sm:$0xff]   ;;  %v843_v23 = vld [vmem:[%s960_s29 + $0x28] sm:$0xff]  }
  0x22   : > { %738 = vmatpush3.bf16.msra.mxu0 %v827_v7  ;;  %v836_v16 = vld [vmem:[%s960_s29 + $0x98] sm:$0xff]   ;;  %v840_v20 = vld [vmem:[%s960_s29 + $0xa0] sm:$0xff]   ;;  %v844_v24 = vld [vmem:[%s960_s29 + $0xa8] sm:$0xff]  }
  0x23   : > { %760 = vmatpush3.bf16.msra.mxu1 %v828_v8  ;;  %739 = vmatprep.subr.bf16.mxu0 %v829_v9  ;;  %v845_v25 = vld [vmem:[%s960_s29 + $0x70] sm:$0xff]   ;;  %v849_v29 = vld [vmem:[%s960_s29 + $0x78] sm:$0xff]   ;;  %v699_v34 = vld.sshfl [vmem:[%s202_s25] sm:$0x33 pattern:$0x75316420] }
  0x24   : > { %761 = vmatprep.subr.bf16.mxu1 %v830_v10  ;;  %v846_v26 = vld [vmem:[%s960_s29 + $0xf0] sm:$0xff]   ;;  %v850_v30 = vld [vmem:[%s960_s29 + $0xf8] sm:$0xff]   ;;  %v296_v38 = vcombine.high %v699_v34, %v699_v34  ;;  %v303_v42 = vrot.slane %v699_v34, %v302_v40  ;;  %v222_v54 = vld [vmem:[#allocation2] sm:$0x1] }
  0x25   : > { %v847_v27 = vld [vmem:[%s960_s29 + $0x30] sm:$0xff]   ;;  %v851_v32 = vld [vmem:[%s960_s29 + $0x38] sm:$0xff]  }
  0x26   : > { %740 = vmatpush3.bf16.msra.mxu0 %v831_v11  ;;  %v848_v28 = vld [vmem:[%s960_s29 + $0xb0] sm:$0xff]   ;;  %v852_v33 = vld [vmem:[%s960_s29 + $0xb8] sm:$0xff]   ;;  %v310_v41 = vrot.slane %v296_v38, %v302_v40  ;;  %v311_v44 = vcombine.high %v303_v42, %v303_v42 }
  0x27   : > { %762 = vmatpush3.bf16.msra.mxu1 %v832_v12  ;;  %741 = vmatprep.subr.bf16.mxu0 %v833_v13 }
  0x28   : > { %763 = vmatprep.subr.bf16.mxu1 %v834_v14  ;;  %541 = vmatprep.mubr.bf16.mxu0 %v310_v41  ;;  %v312_v43 = vcombine.high %v310_v41, %v310_v41 }
  0x2a   : > { %742 = vmatpush3.bf16.msra.mxu0 %v835_v15  ;;  %581 = vmatprep.mubr.bf16.mxu1 %v312_v43 }
  0x2b   : > { %764 = vmatpush3.bf16.msra.mxu1 %v836_v16  ;;  %743 = vmatprep.subr.bf16.mxu0 %v837_v17 }
  0x2c   : > { %765 = vmatprep.subr.bf16.mxu1 %v838_v18 }
  0x2e   : > { %744 = vmatpush3.bf16.msra.mxu0 %v839_v19 }
  0x2f   : > { %766 = vmatpush3.bf16.msra.mxu1 %v840_v20  ;;  %745 = vmatprep.subr.bf16.mxu0 %v841_v21 }
  0x30   : > { %767 = vmatprep.subr.bf16.mxu1 %v842_v22 }
  0x32   : > { %746 = vmatpush3.bf16.msra.mxu0 %v843_v23 }
  0x33   : > { %768 = vmatpush3.bf16.msra.mxu1 %v844_v24  ;;  %747 = vmatprep.subr.bf16.mxu0 %v845_v25 }
  0x34   : > { %769 = vmatprep.subr.bf16.mxu1 %v846_v26 }
  0x36   : > { %748 = vmatpush3.bf16.msra.mxu0 %v847_v27 }
  0x37   : > { %770 = vmatpush3.bf16.msra.mxu1 %v848_v28  ;;  %749 = vmatprep.subr.bf16.mxu0 %v849_v29 }
  0x38   : > { %771 = vmatprep.subr.bf16.mxu1 %v850_v30 }
  0x3a   : > { %750 = vmatpush3.bf16.msra.mxu0 %v851_v32 }
  0x3b   : > { %772 = vmatpush3.bf16.msra.mxu1 %v852_v33 }
  0x3d   : > { %542 = vmatmul.mubr.bf16.vlgmr.msra.gmra.mrb[0].mxu0 %v303_v42 }
  0x3e   : > { %582 = vmatmul.mubr.bf16.vlgmr.msra.gmra.mrb[0].mxu1 %v311_v44 }
 0x110   : > { %v751_v45 = vpop.f32.mrb[0].mxu0 }
 0x111   : > { %v752_v46 = vpop.f32.mrb[1].mxu0  ;;  %v773_v47 = vpop.f32.mrb[0].mxu1 }
 0x112   : > { %v753_v48 = vadd.f32 %v752_v46, %v751_v45  ;;  %v754_v49 = vpop.f32.mrb[2].mxu0  ;;  %v774_v50 = vpop.f32.mrb[1].mxu1 }
 0x113   : > { %v755_v51 = vpop.f32.mrb[3].mxu0  ;;  %v775_v52 = vadd.f32 %v774_v50, %v773_v47  ;;  %v776_v53 = vpop.f32.mrb[2].mxu1  ;;  %594 = sbr.rel (%p732_p9) target bundleno = 290 (0x122), region = 36 }
 0x114   : > { %v777_v55 = vpop.f32.mrb[3].mxu1 }
 0x115   : > { %v584_v56 = vadd.f32 %v775_v52, %v753_v48 }
 0x117   : > { %v589_v57 = vadd.f32 %v584_v56, %v222_v54 }
 0x119   : > { %590 = vst [vmem:[#allocation2] sm:$0x1] %v589_v57 }
 0x120   : > { %v595_v58 = vld [vmem:[#allocation2] sm:$0x1] }
 0x121   : > { %596 = vst [vmem:[%s215_s22] sm:$0x1] %v595_v58 }
 0x122 PF: > { %s12_s13 = sadd.s32 1, %s891_s13   ;;  %s1024_s9 = smov %s883_s11 }
 0x123   : > { %p9_p10 = scmp.ge.s32.totalorder %s12_s13, 34   ;;  %s1025_s10 = smov %s887_s12 }
 0x124   : > { %s1026_s11 = smov %s1029_s14  ;;  %s1027_s12 = smov %s1033_s15 }
 0x125   :  { %11 = sbr.rel (!%p9_p10) target bundleno = 3 (0x3), region = 69 }

</bundles_post_ra>
